<compile_context>
chip_gen: v7x
topology: tpu7x:2x2x1
jax: 0.10.0
libtpu: 0.0.40
codegen_flags: <defaults>
</compile_context>

<pallas_src>
import functools

import numpy as np
import jax
import jax.numpy as jnp
from jax.experimental import pallas as pl
from jax.experimental.pallas import tpu as pltpu

_GMS_C = 0.0026
_GMS_EPS = 1e-12


# ---------------------------------------------------------------------------
# Host-built constant operator matrices (DMA'd to VMEM once: block index is
# always (0, 0) across the batch grid).
# ---------------------------------------------------------------------------
def _band_sum3(n):
    """(n, n): zero-padded 3-tap sum  out[i] = x[i-1] + x[i] + x[i+1]."""
    idx = np.arange(n)
    return (np.abs(idx[:, None] - idx[None, :]) <= 1).astype(np.float32)


def _band_diff(n):
    """(n, n) LEFT-multiply central difference: (D @ X)[i] = X[i+1] - X[i-1]."""
    m = np.zeros((n, n), np.float32)
    i = np.arange(n - 1)
    m[i, i + 1] = 1.0
    m[i + 1, i] = -1.0
    return m


def _avg_pool_matrix(n):
    """(n//2, n): 1-D F.avg_pool2d(kernel=2, stride=2) as a LEFT matrix."""
    m = np.zeros((n // 2, n), np.float32)
    idx = np.arange(n // 2)
    m[idx, 2 * idx] = 0.5
    m[idx, 2 * idx + 1] = 0.5
    return m


def _bilinear_matrix(n_out, n_in):
    """(n_out, n_in): bilinear upsample, align_corners=False (half-pixel)."""
    m = np.zeros((n_out, n_in), np.float32)
    for i in range(n_out):
        src = (i + 0.5) * n_in / n_out - 0.5
        j0 = int(np.floor(src))
        w = src - j0
        m[i, min(max(j0, 0), n_in - 1)] += 1.0 - w
        m[i, min(max(j0 + 1, 0), n_in - 1)] += w
    return m


def _box_matrix(n, k):
    """(n, n): 1-D width-k box filter with zero padding k//2, scaled by 1/k."""
    idx = np.arange(n)
    return (np.abs(idx[:, None] - idx[None, :]) <= (k // 2)).astype(np.float32) / k


# ---------------------------------------------------------------------------
# Fused kernel: one grid step == one image (pred+true slab).
# ---------------------------------------------------------------------------
def _riad_kernel(*refs, C, H, W, num_scales):
    ns = num_scales
    nu = ns - 1
    i = 0
    svbd = refs[i:i + ns]; i += ns          # (2hs, 2hs)   vertical 3-sum (pred|true blockdiag)
    dvbd = refs[i:i + ns]; i += ns          # (2hs, 2hs)   vertical +-1 diff
    shbd = refs[i:i + ns]; i += ns          # (C*ws, C*ws) horizontal 3-sum (per-channel blockdiag)
    dhbd = refs[i:i + ns]; i += ns          # (C*ws, C*ws) horizontal +-1 diff
    cmean = refs[i:i + ns]; i += ns         # (C*ws, ws)   channel mean * 1/(C*ns)
    poolh = refs[i:i + nu]; i += nu         # (2hs, 2*hs_prev)     row pooling
    poolw = refs[i:i + nu]; i += nu         # (C*ws_prev, C*ws)    col pooling
    upsh = refs[i:i + nu]; i += nu          # (H, hs)              bilinear rows
    upsw = refs[i:i + nu]; i += nu          # (ws, W)              bilinear cols
    boxh = refs[i]; i += 1                  # (H, H)/k
    boxw = refs[i]; i += 1                  # (W, W)/k
    x_ref = refs[i]; i += 1                 # (1, 2H, C*W) slab
    out_ref = refs[i]                       # (1, 1, 128)

    dot = functools.partial(jnp.dot, preferred_element_type=jnp.float32)
    c9 = 9.0 * _GMS_C       # Prewitt 1/3 folded into the GMS constants
    eps9 = 9.0 * _GMS_EPS

    cur = x_ref[0]                           # (2H, C*W): pred rows then true rows
    acc = None
    for s in range(ns):
        hs, ws = H >> s, W >> s
        if s > 0:
            # F.avg_pool2d(kernel=2, stride=2) on the whole slab: two matmuls.
            cur = dot(dot(poolh[s - 1][...], cur), poolw[s - 1][...])    # (2hs, C*ws)

        # Separable zero-padded Prewitt as banded matmuls (MXU):
        #   gx = Sv @ X @ Dh ,  gy = Dv @ X @ Sh   (unscaled by 1/3)
        gx = dot(svbd[s][...], dot(cur, dhbd[s][...]))
        gy = dot(dvbd[s][...], dot(cur, shbd[s][...]))
        g2 = gx * gx + gy * gy + eps9                                    # (2hs, C*ws)

        s1 = g2[0:hs, :]                     # pred half (sublane-aligned slice)
        s2 = g2[hs:2 * hs, :]                # true half
        num = 2.0 * jnp.sqrt(s1 * s2) + c9
        gms = num * pl.reciprocal(s1 + s2 + c9, approx=True)             # (hs, C*ws)

        # channel mean (and 1/num_scales) folded into one small matmul.
        gmean = dot(gms, cmean[s][...])                                  # (hs, ws)
        if s > 0:
            # bilinear upsample back to (H, W), align_corners=False, on MXU.
            gmean = dot(dot(upsh[s - 1][...], gmean), upsw[s - 1][...])  # (H, W)
        acc = gmean if acc is None else acc + gmean

    anomalous = 1.0 - acc                                                # (H, W)
    # k x k mean filter (zero pad k//2); 1/k^2 folded into boxh/boxw.
    smoothed = dot(dot(boxh[...], anomalous), boxw[...])
    score = jnp.max(smoothed, axis=(0, 1), keepdims=True)                # (1, 1)
    out_ref[0] = jnp.broadcast_to(score, (1, 128))                       # lane-dense store


# ---------------------------------------------------------------------------
# Wrapper
# ---------------------------------------------------------------------------
def riad_score(pred, true, kernel_size=11, num_scales=3):
    """RIADScore.forward: per-image anomaly score, shape (B,)."""
    pred = pred.astype(jnp.float32)
    true = true.astype(jnp.float32)
    assert pred.shape == true.shape
    B, C, H, W = pred.shape
    assert kernel_size % 2 == 1, "expected odd smoothing kernel (module default is 11)"
    div = 1 << (num_scales - 1)
    # TODO(synk): PyTorch's F.avg_pool2d floors odd spatial sizes; this fused
    # kernel assumes H, W divisible by 2**(num_scales-1).
    assert H % div == 0 and W % div == 0, "H, W must be divisible by 2**(num_scales-1)"

    ns = num_scales
    I2 = np.eye(2, dtype=np.float32)
    IC = np.eye(C, dtype=np.float32)

    svbd, dvbd, shbd, dhbd, cmean = [], [], [], [], []
    poolh, poolw, upsh, upsw = [], [], [], []
    for s in range(ns):
        hs, ws = H >> s, W >> s
        svbd.append(np.kron(I2, _band_sum3(hs)))              # pred|true block-diag row ops
        dvbd.append(np.kron(I2, _band_diff(hs)))
        shbd.append(np.kron(IC, _band_sum3(ws)))               # per-channel block-diag col ops
        dhbd.append(np.kron(IC, np.ascontiguousarray(_band_diff(ws).T)))
        cm = np.zeros((C * ws, ws), np.float32)
        eye = np.eye(ws, dtype=np.float32) / (C * ns)          # fold 1/C and 1/num_scales
        for c in range(C):
            cm[c * ws:(c + 1) * ws, :] = eye
        cmean.append(cm)
        if s > 0:
            hp, wp = H >> (s - 1), W >> (s - 1)
            poolh.append(np.kron(I2, _avg_pool_matrix(hp)))                          # (2hs, 2hp)
            poolw.append(np.kron(IC, np.ascontiguousarray(_avg_pool_matrix(wp).T)))  # (C*wp, C*ws)
            upsh.append(_bilinear_matrix(H, hs))                                     # (H, hs)
            upsw.append(np.ascontiguousarray(_bilinear_matrix(W, ws).T))             # (ws, W)

    mats_np = (svbd + dvbd + shbd + dhbd + cmean + poolh + poolw + upsh + upsw
               + [_box_matrix(H, kernel_size), _box_matrix(W, kernel_size)])
    mats = [jnp.asarray(m) for m in mats_np]

    # Lane-dense slab per image: rows [0:H)=pred, [H:2H)=true; lanes per channel.
    def to_slab(a):
        return a.transpose(0, 2, 1, 3).reshape(B, H, C * W)
    slab = jnp.concatenate([to_slab(pred), to_slab(true)], axis=1)      # (B, 2H, C*W)

    # Advisory cost estimate so XLA schedules the custom call sensibly.
    flops = 0
    for s in range(ns):
        hs, ws = H >> s, W >> s
        rows, cols = 2 * hs, C * ws
        if s > 0:
            pr, pc = 2 * (H >> (s - 1)), C * (W >> (s - 1))
            flops += 2 * rows * pr * pc + 2 * rows * pc * cols          # pooling
            flops += 2 * H * hs * ws + 2 * H * ws * W                   # upsample
        flops += 2 * (2 * rows * cols * cols + 2 * rows * rows * cols)  # gx, gy
        flops += 2 * hs * cols * ws + 12 * rows * cols                  # cmean + elementwise
    flops += 2 * H * H * W + 2 * H * W * W + 4 * H * W                  # box + finalize
    flops *= B
    trans = B * sum(2 * (H >> s) * C * (W >> s) for s in range(ns))     # sqrt + rcp
    bytes_acc = 4 * (B * (2 * C * H * W + 128) + sum(int(m.size) for m in mats_np))

    kernel = functools.partial(_riad_kernel, C=C, H=H, W=W, num_scales=ns)

    out = pl.pallas_call(
        kernel,
        grid=(B,),
        in_specs=(
            [pl.BlockSpec(m.shape, lambda b: (0, 0)) for m in mats_np]
            + [pl.BlockSpec((1, 2 * H, C * W), lambda b: (b, 0, 0))]),
        out_specs=pl.BlockSpec((1, 1, 128), lambda b: (b, 0, 0)),
        out_shape=jax.ShapeDtypeStruct((B, 1, 128), jnp.float32),
        compiler_params=pltpu.CompilerParams(
            dimension_semantics=("parallel",),          # batch axis -> 2 TCs on v7x
            vmem_limit_bytes=32 * 1024 * 1024),
        cost_estimate=pl.CostEstimate(flops=int(flops), transcendentals=int(trans),
                                      bytes_accessed=int(bytes_acc)),
    )(*mats, slab)
    return out[:, 0, 0]


if __name__ == "__main__":
    key = jax.random.PRNGKey(0)
    k1, k2 = jax.random.split(key)
    # Small NCHW inputs consistent with RIAD (in_channels=3); 32x32 keeps the
    # coarsest scale at 8x8 while staying tiny.
    pred = jax.random.uniform(k1, (2, 3, 32, 32), dtype=jnp.float32)
    true = jax.random.uniform(k2, (2, 3, 32, 32), dtype=jnp.float32)

    scores = riad_score(pred, true, kernel_size=11, num_scales=3)
    scores = jax.block_until_ready(scores)
    assert scores.shape == (2,)
    assert bool(jnp.all(jnp.isfinite(scores)))
    print("KERNEL_OK")
</pallas_src>

<mosaic_0001>
module attributes {stable_mosaic.version = 11 : i64} {
  func.func @_riad_kernel(%arg0: i32, %arg1: memref<64x64xf32, #tpu.memory_space<vmem>>, %arg2: memref<32x32xf32, #tpu.memory_space<vmem>>, %arg3: memref<16x16xf32, #tpu.memory_space<vmem>>, %arg4: memref<64x64xf32, #tpu.memory_space<vmem>>, %arg5: memref<32x32xf32, #tpu.memory_space<vmem>>, %arg6: memref<16x16xf32, #tpu.memory_space<vmem>>, %arg7: memref<96x96xf32, #tpu.memory_space<vmem>>, %arg8: memref<48x48xf32, #tpu.memory_space<vmem>>, %arg9: memref<24x24xf32, #tpu.memory_space<vmem>>, %arg10: memref<96x96xf32, #tpu.memory_space<vmem>>, %arg11: memref<48x48xf32, #tpu.memory_space<vmem>>, %arg12: memref<24x24xf32, #tpu.memory_space<vmem>>, %arg13: memref<96x32xf32, #tpu.memory_space<vmem>>, %arg14: memref<48x16xf32, #tpu.memory_space<vmem>>, %arg15: memref<24x8xf32, #tpu.memory_space<vmem>>, %arg16: memref<32x64xf32, #tpu.memory_space<vmem>>, %arg17: memref<16x32xf32, #tpu.memory_space<vmem>>, %arg18: memref<96x48xf32, #tpu.memory_space<vmem>>, %arg19: memref<48x24xf32, #tpu.memory_space<vmem>>, %arg20: memref<32x16xf32, #tpu.memory_space<vmem>>, %arg21: memref<32x8xf32, #tpu.memory_space<vmem>>, %arg22: memref<16x32xf32, #tpu.memory_space<vmem>>, %arg23: memref<8x32xf32, #tpu.memory_space<vmem>>, %arg24: memref<32x32xf32, #tpu.memory_space<vmem>>, %arg25: memref<32x32xf32, #tpu.memory_space<vmem>>, %arg26: memref<1x64x96xf32, #tpu.memory_space<vmem>>, %arg27: memref<1x1x128xf32, #tpu.memory_space<vmem>>) attributes {dimension_semantics = [#tpu.dimension_semantics<parallel>], iteration_bounds = array<i64: 2>, scalar_prefetch = 0 : i64, scratch_operands = 0 : i64, tpu.core_type = #tpu.core_type<tc>, window_params = [{pipeline_mode = #tpu.pipeline_mode<synchronous>, transform_indices = @transform_0, window_bounds = array<i64: 64, 64>}, {pipeline_mode = #tpu.pipeline_mode<synchronous>, transform_indices = @transform_1, window_bounds = array<i64: 32, 32>}, {pipeline_mode = #tpu.pipeline_mode<synchronous>, transform_indices = @transform_2, window_bounds = array<i64: 16, 16>}, {pipeline_mode = #tpu.pipeline_mode<synchronous>, transform_indices = @transform_3, window_bounds = array<i64: 64, 64>}, {pipeline_mode = #tpu.pipeline_mode<synchronous>, transform_indices = @transform_4, window_bounds = array<i64: 32, 32>}, {pipeline_mode = #tpu.pipeline_mode<synchronous>, transform_indices = @transform_5, window_bounds = array<i64: 16, 16>}, {pipeline_mode = #tpu.pipeline_mode<synchronous>, transform_indices = @transform_6, window_bounds = array<i64: 96, 96>}, {pipeline_mode = #tpu.pipeline_mode<synchronous>, transform_indices = @transform_7, window_bounds = array<i64: 48, 48>}, {pipeline_mode = #tpu.pipeline_mode<synchronous>, transform_indices = @transform_8, window_bounds = array<i64: 24, 24>}, {pipeline_mode = #tpu.pipeline_mode<synchronous>, transform_indices = @transform_9, window_bounds = array<i64: 96, 96>}, {pipeline_mode = #tpu.pipeline_mode<synchronous>, transform_indices = @transform_10, window_bounds = array<i64: 48, 48>}, {pipeline_mode = #tpu.pipeline_mode<synchronous>, transform_indices = @transform_11, window_bounds = array<i64: 24, 24>}, {pipeline_mode = #tpu.pipeline_mode<synchronous>, transform_indices = @transform_12, window_bounds = array<i64: 96, 32>}, {pipeline_mode = #tpu.pipeline_mode<synchronous>, transform_indices = @transform_13, window_bounds = array<i64: 48, 16>}, {pipeline_mode = #tpu.pipeline_mode<synchronous>, transform_indices = @transform_14, window_bounds = array<i64: 24, 8>}, {pipeline_mode = #tpu.pipeline_mode<synchronous>, transform_indices = @transform_15, window_bounds = array<i64: 32, 64>}, {pipeline_mode = #tpu.pipeline_mode<synchronous>, transform_indices = @transform_16, window_bounds = array<i64: 16, 32>}, {pipeline_mode = #tpu.pipeline_mode<synchronous>, transform_indices = @transform_17, window_bounds = array<i64: 96, 48>}, {pipeline_mode = #tpu.pipeline_mode<synchronous>, transform_indices = @transform_18, window_bounds = array<i64: 48, 24>}, {pipeline_mode = #tpu.pipeline_mode<synchronous>, transform_indices = @transform_19, window_bounds = array<i64: 32, 16>}, {pipeline_mode = #tpu.pipeline_mode<synchronous>, transform_indices = @transform_20, window_bounds = array<i64: 32, 8>}, {pipeline_mode = #tpu.pipeline_mode<synchronous>, transform_indices = @transform_21, window_bounds = array<i64: 16, 32>}, {pipeline_mode = #tpu.pipeline_mode<synchronous>, transform_indices = @transform_22, window_bounds = array<i64: 8, 32>}, {pipeline_mode = #tpu.pipeline_mode<synchronous>, transform_indices = @transform_23, window_bounds = array<i64: 32, 32>}, {pipeline_mode = #tpu.pipeline_mode<synchronous>, transform_indices = @transform_24, window_bounds = array<i64: 32, 32>}, {transform_indices = @transform_25, window_bounds = array<i64: 1, 64, 96>}, {transform_indices = @transform_26, window_bounds = array<i64: 1, 1, 128>}]} {
    %c0 = arith.constant 0 : index
    %c0_0 = arith.constant 0 : index
    %c0_1 = arith.constant 0 : index
    %0 = vector.load %arg26[%c0, %c0_0, %c0_1] : memref<1x64x96xf32, #tpu.memory_space<vmem>>, vector<1x64x96xf32>
    %1 = vector.shape_cast %0 : vector<1x64x96xf32> to vector<64x96xf32>
    %c0_2 = arith.constant 0 : index
    %c0_3 = arith.constant 0 : index
    %2 = vector.load %arg1[%c0_2, %c0_3] : memref<64x64xf32, #tpu.memory_space<vmem>>, vector<64x64xf32>
    %c0_4 = arith.constant 0 : index
    %c0_5 = arith.constant 0 : index
    %3 = vector.load %arg10[%c0_4, %c0_5] : memref<96x96xf32, #tpu.memory_space<vmem>>, vector<96x96xf32>
    %cst = arith.constant dense<0.000000e+00> : vector<64x96xf32>
    %4 = tpu.matmul %1, %3, %cst {dimension_numbers = #tpu.dot_dimension_numbers<[1], [0], [0], [1], [0, 0, 1, 1], [], []>} : vector<64x96xf32>, vector<96x96xf32>, vector<64x96xf32> -> vector<64x96xf32>
    %cst_6 = arith.constant dense<0.000000e+00> : vector<64x96xf32>
    %5 = tpu.matmul %2, %4, %cst_6 {dimension_numbers = #tpu.dot_dimension_numbers<[1], [0], [0], [1], [0, 0, 1, 1], [], []>} : vector<64x64xf32>, vector<64x96xf32>, vector<64x96xf32> -> vector<64x96xf32>
    %c0_7 = arith.constant 0 : index
    %c0_8 = arith.constant 0 : index
    %6 = vector.load %arg4[%c0_7, %c0_8] : memref<64x64xf32, #tpu.memory_space<vmem>>, vector<64x64xf32>
    %c0_9 = arith.constant 0 : index
    %c0_10 = arith.constant 0 : index
    %7 = vector.load %arg7[%c0_9, %c0_10] : memref<96x96xf32, #tpu.memory_space<vmem>>, vector<96x96xf32>
    %cst_11 = arith.constant dense<0.000000e+00> : vector<64x96xf32>
    %8 = tpu.matmul %1, %7, %cst_11 {dimension_numbers = #tpu.dot_dimension_numbers<[1], [0], [0], [1], [0, 0, 1, 1], [], []>} : vector<64x96xf32>, vector<96x96xf32>, vector<64x96xf32> -> vector<64x96xf32>
    %cst_12 = arith.constant dense<0.000000e+00> : vector<64x96xf32>
    %9 = tpu.matmul %6, %8, %cst_12 {dimension_numbers = #tpu.dot_dimension_numbers<[1], [0], [0], [1], [0, 0, 1, 1], [], []>} : vector<64x64xf32>, vector<64x96xf32>, vector<64x96xf32> -> vector<64x96xf32>
    %10 = arith.mulf %5, %5 : vector<64x96xf32>
    %11 = arith.mulf %9, %9 : vector<64x96xf32>
    %12 = arith.addf %10, %11 : vector<64x96xf32>
    %cst_13 = arith.constant 9.000000e-12 : f32
    %13 = vector.broadcast %cst_13 : f32 to vector<64x96xf32>
    %14 = arith.addf %12, %13 : vector<64x96xf32>
    %15 = vector.extract_strided_slice %14 {offsets = [0, 0], sizes = [32, 96], strides = [1, 1]} : vector<64x96xf32> to vector<32x96xf32>
    %16 = vector.extract_strided_slice %14 {offsets = [32, 0], sizes = [32, 96], strides = [1, 1]} : vector<64x96xf32> to vector<32x96xf32>
    %17 = arith.mulf %15, %16 : vector<32x96xf32>
    %18 = math.sqrt %17 : vector<32x96xf32>
    %cst_14 = arith.constant 2.000000e+00 : f32
    %19 = vector.broadcast %cst_14 : f32 to vector<32x96xf32>
    %20 = arith.mulf %19, %18 : vector<32x96xf32>
    %cst_15 = arith.constant 2.340000e-02 : f32
    %21 = vector.broadcast %cst_15 : f32 to vector<32x96xf32>
    %22 = arith.addf %20, %21 : vector<32x96xf32>
    %23 = arith.addf %15, %16 : vector<32x96xf32>
    %cst_16 = arith.constant 2.340000e-02 : f32
    %24 = vector.broadcast %cst_16 : f32 to vector<32x96xf32>
    %25 = arith.addf %23, %24 : vector<32x96xf32>
    %26 = tpu.reciprocal %25 {approx = true} : vector<32x96xf32> -> vector<32x96xf32>
    %27 = arith.mulf %22, %26 : vector<32x96xf32>
    %c0_17 = arith.constant 0 : index
    %c0_18 = arith.constant 0 : index
    %28 = vector.load %arg13[%c0_17, %c0_18] : memref<96x32xf32, #tpu.memory_space<vmem>>, vector<96x32xf32>
    %cst_19 = arith.constant dense<0.000000e+00> : vector<32x32xf32>
    %29 = tpu.matmul %27, %28, %cst_19 {dimension_numbers = #tpu.dot_dimension_numbers<[1], [0], [0], [1], [0, 0, 1, 1], [], []>} : vector<32x96xf32>, vector<96x32xf32>, vector<32x32xf32> -> vector<32x32xf32>
    %c0_20 = arith.constant 0 : index
    %c0_21 = arith.constant 0 : index
    %30 = vector.load %arg16[%c0_20, %c0_21] : memref<32x64xf32, #tpu.memory_space<vmem>>, vector<32x64xf32>
    %cst_22 = arith.constant dense<0.000000e+00> : vector<32x96xf32>
    %31 = tpu.matmul %30, %1, %cst_22 {dimension_numbers = #tpu.dot_dimension_numbers<[1], [0], [0], [1], [0, 0, 1, 1], [], []>} : vector<32x64xf32>, vector<64x96xf32>, vector<32x96xf32> -> vector<32x96xf32>
    %c0_23 = arith.constant 0 : index
    %c0_24 = arith.constant 0 : index
    %32 = vector.load %arg18[%c0_23, %c0_24] : memref<96x48xf32, #tpu.memory_space<vmem>>, vector<96x48xf32>
    %cst_25 = arith.constant dense<0.000000e+00> : vector<32x48xf32>
    %33 = tpu.matmul %31, %32, %cst_25 {dimension_numbers = #tpu.dot_dimension_numbers<[1], [0], [0], [1], [0, 0, 1, 1], [], []>} : vector<32x96xf32>, vector<96x48xf32>, vector<32x48xf32> -> vector<32x48xf32>
    %c0_26 = arith.constant 0 : index
    %c0_27 = arith.constant 0 : index
    %34 = vector.load %arg2[%c0_26, %c0_27] : memref<32x32xf32, #tpu.memory_space<vmem>>, vector<32x32xf32>
    %c0_28 = arith.constant 0 : index
    %c0_29 = arith.constant 0 : index
    %35 = vector.load %arg11[%c0_28, %c0_29] : memref<48x48xf32, #tpu.memory_space<vmem>>, vector<48x48xf32>
    %cst_30 = arith.constant dense<0.000000e+00> : vector<32x48xf32>
    %36 = tpu.matmul %33, %35, %cst_30 {dimension_numbers = #tpu.dot_dimension_numbers<[1], [0], [0], [1], [0, 0, 1, 1], [], []>} : vector<32x48xf32>, vector<48x48xf32>, vector<32x48xf32> -> vector<32x48xf32>
    %cst_31 = arith.constant dense<0.000000e+00> : vector<32x48xf32>
    %37 = tpu.matmul %34, %36, %cst_31 {dimension_numbers = #tpu.dot_dimension_numbers<[1], [0], [0], [1], [0, 0, 1, 1], [], []>} : vector<32x32xf32>, vector<32x48xf32>, vector<32x48xf32> -> vector<32x48xf32>
    %c0_32 = arith.constant 0 : index
    %c0_33 = arith.constant 0 : index
    %38 = vector.load %arg5[%c0_32, %c0_33] : memref<32x32xf32, #tpu.memory_space<vmem>>, vector<32x32xf32>
    %c0_34 = arith.constant 0 : index
    %c0_35 = arith.constant 0 : index
    %39 = vector.load %arg8[%c0_34, %c0_35] : memref<48x48xf32, #tpu.memory_space<vmem>>, vector<48x48xf32>
    %cst_36 = arith.constant dense<0.000000e+00> : vector<32x48xf32>
    %40 = tpu.matmul %33, %39, %cst_36 {dimension_numbers = #tpu.dot_dimension_numbers<[1], [0], [0], [1], [0, 0, 1, 1], [], []>} : vector<32x48xf32>, vector<48x48xf32>, vector<32x48xf32> -> vector<32x48xf32>
    %cst_37 = arith.constant dense<0.000000e+00> : vector<32x48xf32>
    %41 = tpu.matmul %38, %40, %cst_37 {dimension_numbers = #tpu.dot_dimension_numbers<[1], [0], [0], [1], [0, 0, 1, 1], [], []>} : vector<32x32xf32>, vector<32x48xf32>, vector<32x48xf32> -> vector<32x48xf32>
    %42 = arith.mulf %37, %37 : vector<32x48xf32>
    %43 = arith.mulf %41, %41 : vector<32x48xf32>
    %44 = arith.addf %42, %43 : vector<32x48xf32>
    %cst_38 = arith.constant 9.000000e-12 : f32
    %45 = vector.broadcast %cst_38 : f32 to vector<32x48xf32>
    %46 = arith.addf %44, %45 : vector<32x48xf32>
    %47 = vector.extract_strided_slice %46 {offsets = [0, 0], sizes = [16, 48], strides = [1, 1]} : vector<32x48xf32> to vector<16x48xf32>
    %48 = vector.extract_strided_slice %46 {offsets = [16, 0], sizes = [16, 48], strides = [1, 1]} : vector<32x48xf32> to vector<16x48xf32>
    %49 = arith.mulf %47, %48 : vector<16x48xf32>
    %50 = math.sqrt %49 : vector<16x48xf32>
    %cst_39 = arith.constant 2.000000e+00 : f32
    %51 = vector.broadcast %cst_39 : f32 to vector<16x48xf32>
    %52 = arith.mulf %51, %50 : vector<16x48xf32>
    %cst_40 = arith.constant 2.340000e-02 : f32
    %53 = vector.broadcast %cst_40 : f32 to vector<16x48xf32>
    %54 = arith.addf %52, %53 : vector<16x48xf32>
    %55 = arith.addf %47, %48 : vector<16x48xf32>
    %cst_41 = arith.constant 2.340000e-02 : f32
    %56 = vector.broadcast %cst_41 : f32 to vector<16x48xf32>
    %57 = arith.addf %55, %56 : vector<16x48xf32>
    %58 = tpu.reciprocal %57 {approx = true} : vector<16x48xf32> -> vector<16x48xf32>
    %59 = arith.mulf %54, %58 : vector<16x48xf32>
    %c0_42 = arith.constant 0 : index
    %c0_43 = arith.constant 0 : index
    %60 = vector.load %arg14[%c0_42, %c0_43] : memref<48x16xf32, #tpu.memory_space<vmem>>, vector<48x16xf32>
    %cst_44 = arith.constant dense<0.000000e+00> : vector<16x16xf32>
    %61 = tpu.matmul %59, %60, %cst_44 {dimension_numbers = #tpu.dot_dimension_numbers<[1], [0], [0], [1], [0, 0, 1, 1], [], []>} : vector<16x48xf32>, vector<48x16xf32>, vector<16x16xf32> -> vector<16x16xf32>
    %c0_45 = arith.constant 0 : index
    %c0_46 = arith.constant 0 : index
    %62 = vector.load %arg20[%c0_45, %c0_46] : memref<32x16xf32, #tpu.memory_space<vmem>>, vector<32x16xf32>
    %cst_47 = arith.constant dense<0.000000e+00> : vector<32x16xf32>
    %63 = tpu.matmul %62, %61, %cst_47 {dimension_numbers = #tpu.dot_dimension_numbers<[1], [0], [0], [1], [0, 0, 1, 1], [], []>} : vector<32x16xf32>, vector<16x16xf32>, vector<32x16xf32> -> vector<32x16xf32>
    %c0_48 = arith.constant 0 : index
    %c0_49 = arith.constant 0 : index
    %64 = vector.load %arg22[%c0_48, %c0_49] : memref<16x32xf32, #tpu.memory_space<vmem>>, vector<16x32xf32>
    %cst_50 = arith.constant dense<0.000000e+00> : vector<32x32xf32>
    %65 = tpu.matmul %63, %64, %cst_50 {dimension_numbers = #tpu.dot_dimension_numbers<[1], [0], [0], [1], [0, 0, 1, 1], [], []>} : vector<32x16xf32>, vector<16x32xf32>, vector<32x32xf32> -> vector<32x32xf32>
    %66 = arith.addf %29, %65 : vector<32x32xf32>
    %c0_51 = arith.constant 0 : index
    %c0_52 = arith.constant 0 : index
    %67 = vector.load %arg17[%c0_51, %c0_52] : memref<16x32xf32, #tpu.memory_space<vmem>>, vector<16x32xf32>
    %cst_53 = arith.constant dense<0.000000e+00> : vector<16x48xf32>
    %68 = tpu.matmul %67, %33, %cst_53 {dimension_numbers = #tpu.dot_dimension_numbers<[1], [0], [0], [1], [0, 0, 1, 1], [], []>} : vector<16x32xf32>, vector<32x48xf32>, vector<16x48xf32> -> vector<16x48xf32>
    %c0_54 = arith.constant 0 : index
    %c0_55 = arith.constant 0 : index
    %69 = vector.load %arg19[%c0_54, %c0_55] : memref<48x24xf32, #tpu.memory_space<vmem>>, vector<48x24xf32>
    %cst_56 = arith.constant dense<0.000000e+00> : vector<16x24xf32>
    %70 = tpu.matmul %68, %69, %cst_56 {dimension_numbers = #tpu.dot_dimension_numbers<[1], [0], [0], [1], [0, 0, 1, 1], [], []>} : vector<16x48xf32>, vector<48x24xf32>, vector<16x24xf32> -> vector<16x24xf32>
    %c0_57 = arith.constant 0 : index
    %c0_58 = arith.constant 0 : index
    %71 = vector.load %arg3[%c0_57, %c0_58] : memref<16x16xf32, #tpu.memory_space<vmem>>, vector<16x16xf32>
    %c0_59 = arith.constant 0 : index
    %c0_60 = arith.constant 0 : index
    %72 = vector.load %arg12[%c0_59, %c0_60] : memref<24x24xf32, #tpu.memory_space<vmem>>, vector<24x24xf32>
    %cst_61 = arith.constant dense<0.000000e+00> : vector<16x24xf32>
    %73 = tpu.matmul %70, %72, %cst_61 {dimension_numbers = #tpu.dot_dimension_numbers<[1], [0], [0], [1], [0, 0, 1, 1], [], []>} : vector<16x24xf32>, vector<24x24xf32>, vector<16x24xf32> -> vector<16x24xf32>
    %cst_62 = arith.constant dense<0.000000e+00> : vector<16x24xf32>
    %74 = tpu.matmul %71, %73, %cst_62 {dimension_numbers = #tpu.dot_dimension_numbers<[1], [0], [0], [1], [0, 0, 1, 1], [], []>} : vector<16x16xf32>, vector<16x24xf32>, vector<16x24xf32> -> vector<16x24xf32>
    %c0_63 = arith.constant 0 : index
    %c0_64 = arith.constant 0 : index
    %75 = vector.load %arg6[%c0_63, %c0_64] : memref<16x16xf32, #tpu.memory_space<vmem>>, vector<16x16xf32>
    %c0_65 = arith.constant 0 : index
    %c0_66 = arith.constant 0 : index
    %76 = vector.load %arg9[%c0_65, %c0_66] : memref<24x24xf32, #tpu.memory_space<vmem>>, vector<24x24xf32>
    %cst_67 = arith.constant dense<0.000000e+00> : vector<16x24xf32>
    %77 = tpu.matmul %70, %76, %cst_67 {dimension_numbers = #tpu.dot_dimension_numbers<[1], [0], [0], [1], [0, 0, 1, 1], [], []>} : vector<16x24xf32>, vector<24x24xf32>, vector<16x24xf32> -> vector<16x24xf32>
    %cst_68 = arith.constant dense<0.000000e+00> : vector<16x24xf32>
    %78 = tpu.matmul %75, %77, %cst_68 {dimension_numbers = #tpu.dot_dimension_numbers<[1], [0], [0], [1], [0, 0, 1, 1], [], []>} : vector<16x16xf32>, vector<16x24xf32>, vector<16x24xf32> -> vector<16x24xf32>
    %79 = arith.mulf %74, %74 : vector<16x24xf32>
    %80 = arith.mulf %78, %78 : vector<16x24xf32>
    %81 = arith.addf %79, %80 : vector<16x24xf32>
    %cst_69 = arith.constant 9.000000e-12 : f32
    %82 = vector.broadcast %cst_69 : f32 to vector<16x24xf32>
    %83 = arith.addf %81, %82 : vector<16x24xf32>
    %84 = vector.extract_strided_slice %83 {offsets = [0, 0], sizes = [8, 24], strides = [1, 1]} : vector<16x24xf32> to vector<8x24xf32>
    %85 = vector.extract_strided_slice %83 {offsets = [8, 0], sizes = [8, 24], strides = [1, 1]} : vector<16x24xf32> to vector<8x24xf32>
    %86 = arith.mulf %84, %85 : vector<8x24xf32>
    %87 = math.sqrt %86 : vector<8x24xf32>
    %cst_70 = arith.constant 2.000000e+00 : f32
    %88 = vector.broadcast %cst_70 : f32 to vector<8x24xf32>
    %89 = arith.mulf %88, %87 : vector<8x24xf32>
    %cst_71 = arith.constant 2.340000e-02 : f32
    %90 = vector.broadcast %cst_71 : f32 to vector<8x24xf32>
    %91 = arith.addf %89, %90 : vector<8x24xf32>
    %92 = arith.addf %84, %85 : vector<8x24xf32>
    %cst_72 = arith.constant 2.340000e-02 : f32
    %93 = vector.broadcast %cst_72 : f32 to vector<8x24xf32>
    %94 = arith.addf %92, %93 : vector<8x24xf32>
    %95 = tpu.reciprocal %94 {approx = true} : vector<8x24xf32> -> vector<8x24xf32>
    %96 = arith.mulf %91, %95 : vector<8x24xf32>
    %c0_73 = arith.constant 0 : index
    %c0_74 = arith.constant 0 : index
    %97 = vector.load %arg15[%c0_73, %c0_74] : memref<24x8xf32, #tpu.memory_space<vmem>>, vector<24x8xf32>
    %cst_75 = arith.constant dense<0.000000e+00> : vector<8x8xf32>
    %98 = tpu.matmul %96, %97, %cst_75 {dimension_numbers = #tpu.dot_dimension_numbers<[1], [0], [0], [1], [0, 0, 1, 1], [], []>} : vector<8x24xf32>, vector<24x8xf32>, vector<8x8xf32> -> vector<8x8xf32>
    %c0_76 = arith.constant 0 : index
    %c0_77 = arith.constant 0 : index
    %99 = vector.load %arg21[%c0_76, %c0_77] : memref<32x8xf32, #tpu.memory_space<vmem>>, vector<32x8xf32>
    %cst_78 = arith.constant dense<0.000000e+00> : vector<32x8xf32>
    %100 = tpu.matmul %99, %98, %cst_78 {dimension_numbers = #tpu.dot_dimension_numbers<[1], [0], [0], [1], [0, 0, 1, 1], [], []>} : vector<32x8xf32>, vector<8x8xf32>, vector<32x8xf32> -> vector<32x8xf32>
    %c0_79 = arith.constant 0 : index
    %c0_80 = arith.constant 0 : index
    %101 = vector.load %arg23[%c0_79, %c0_80] : memref<8x32xf32, #tpu.memory_space<vmem>>, vector<8x32xf32>
    %cst_81 = arith.constant dense<0.000000e+00> : vector<32x32xf32>
    %102 = tpu.matmul %100, %101, %cst_81 {dimension_numbers = #tpu.dot_dimension_numbers<[1], [0], [0], [1], [0, 0, 1, 1], [], []>} : vector<32x8xf32>, vector<8x32xf32>, vector<32x32xf32> -> vector<32x32xf32>
    %103 = arith.addf %66, %102 : vector<32x32xf32>
    %cst_82 = arith.constant 1.000000e+00 : f32
    %104 = vector.broadcast %cst_82 : f32 to vector<32x32xf32>
    %105 = arith.subf %104, %103 : vector<32x32xf32>
    %c0_83 = arith.constant 0 : index
    %c0_84 = arith.constant 0 : index
    %106 = vector.load %arg24[%c0_83, %c0_84] : memref<32x32xf32, #tpu.memory_space<vmem>>, vector<32x32xf32>
    %cst_85 = arith.constant dense<0.000000e+00> : vector<32x32xf32>
    %107 = tpu.matmul %106, %105, %cst_85 {dimension_numbers = #tpu.dot_dimension_numbers<[1], [0], [0], [1], [0, 0, 1, 1], [], []>} : vector<32x32xf32>, vector<32x32xf32>, vector<32x32xf32> -> vector<32x32xf32>
    %c0_86 = arith.constant 0 : index
    %c0_87 = arith.constant 0 : index
    %108 = vector.load %arg25[%c0_86, %c0_87] : memref<32x32xf32, #tpu.memory_space<vmem>>, vector<32x32xf32>
    %cst_88 = arith.constant dense<0.000000e+00> : vector<32x32xf32>
    %109 = tpu.matmul %107, %108, %cst_88 {dimension_numbers = #tpu.dot_dimension_numbers<[1], [0], [0], [1], [0, 0, 1, 1], [], []>} : vector<32x32xf32>, vector<32x32xf32>, vector<32x32xf32> -> vector<32x32xf32>
    %110 = vector.shape_cast %109 : vector<32x32xf32> to vector<1x32x32xf32>
    %cst_89 = arith.constant dense<0xFF800000> : vector<1xf32>
    %111 = vector.multi_reduction <maximumf>, %110, %cst_89 [1, 2] : vector<1x32x32xf32> to vector<1xf32>
    %112 = vector.shape_cast %111 : vector<1xf32> to vector<1x1x1xf32>
    %113 = vector.extract %112[0, 0, 0] : f32 from vector<1x1x1xf32>
    %114 = vector.broadcast %113 : f32 to vector<1x1xf32>
    %115 = vector.shape_cast %114 : vector<1x1xf32> to vector<1x1xf32>
    %116 = vector.broadcast %115 : vector<1x1xf32> to vector<1x128xf32>
    %c0_90 = arith.constant 0 : index
    %c0_91 = arith.constant 0 : index
    %c0_92 = arith.constant 0 : index
    %117 = vector.load %arg27[%c0_90, %c0_91, %c0_92] : memref<1x1x128xf32, #tpu.memory_space<vmem>>, vector<1x1x128xf32>
    %118 = vector.shape_cast %117 : vector<1x1x128xf32> to vector<1x128xf32>
    %119 = vector.shape_cast %116 : vector<1x128xf32> to vector<1x1x128xf32>
    tpu.vector_store %arg27[%c0_90, %c0_91, %c0_92], %119 {strides = array<i32>} : memref<1x1x128xf32, #tpu.memory_space<vmem>>, vector<1x1x128xf32>,
    return
  }
  func.func @transform_0(%arg0: i32) -> (i32, i32) {
    %c0_i32 = arith.constant 0 : i32
    %c0_i32_0 = arith.constant 0 : i32
    %c0_i32_1 = arith.constant 0 : i32
    return %c0_i32, %c0_i32_0 : i32, i32
  }
  func.func @transform_1(%arg0: i32) -> (i32, i32) {
    %c0_i32 = arith.constant 0 : i32
    %c0_i32_0 = arith.constant 0 : i32
    %c0_i32_1 = arith.constant 0 : i32
    return %c0_i32, %c0_i32_0 : i32, i32
  }
  func.func @transform_2(%arg0: i32) -> (i32, i32) {
    %c0_i32 = arith.constant 0 : i32
    %c0_i32_0 = arith.constant 0 : i32
    %c0_i32_1 = arith.constant 0 : i32
    return %c0_i32, %c0_i32_0 : i32, i32
  }
  func.func @transform_3(%arg0: i32) -> (i32, i32) {
    %c0_i32 = arith.constant 0 : i32
    %c0_i32_0 = arith.constant 0 : i32
    %c0_i32_1 = arith.constant 0 : i32
    return %c0_i32, %c0_i32_0 : i32, i32
  }
  func.func @transform_4(%arg0: i32) -> (i32, i32) {
    %c0_i32 = arith.constant 0 : i32
    %c0_i32_0 = arith.constant 0 : i32
    %c0_i32_1 = arith.constant 0 : i32
    return %c0_i32, %c0_i32_0 : i32, i32
  }
  func.func @transform_5(%arg0: i32) -> (i32, i32) {
    %c0_i32 = arith.constant 0 : i32
    %c0_i32_0 = arith.constant 0 : i32
    %c0_i32_1 = arith.constant 0 : i32
    return %c0_i32, %c0_i32_0 : i32, i32
  }
  func.func @transform_6(%arg0: i32) -> (i32, i32) {
    %c0_i32 = arith.constant 0 : i32
    %c0_i32_0 = arith.constant 0 : i32
    %c0_i32_1 = arith.constant 0 : i32
    return %c0_i32, %c0_i32_0 : i32, i32
  }
  func.func @transform_7(%arg0: i32) -> (i32, i32) {
    %c0_i32 = arith.constant 0 : i32
    %c0_i32_0 = arith.constant 0 : i32
    %c0_i32_1 = arith.constant 0 : i32
    return %c0_i32, %c0_i32_0 : i32, i32
  }
  func.func @transform_8(%arg0: i32) -> (i32, i32) {
    %c0_i32 = arith.constant 0 : i32
    %c0_i32_0 = arith.constant 0 : i32
    %c0_i32_1 = arith.constant 0 : i32
    return %c0_i32, %c0_i32_0 : i32, i32
  }
  func.func @transform_9(%arg0: i32) -> (i32, i32) {
    %c0_i32 = arith.constant 0 : i32
    %c0_i32_0 = arith.constant 0 : i32
    %c0_i32_1 = arith.constant 0 : i32
    return %c0_i32, %c0_i32_0 : i32, i32
  }
  func.func @transform_10(%arg0: i32) -> (i32, i32) {
    %c0_i32 = arith.constant 0 : i32
    %c0_i32_0 = arith.constant 0 : i32
    %c0_i32_1 = arith.constant 0 : i32
    return %c0_i32, %c0_i32_0 : i32, i32
  }
  func.func @transform_11(%arg0: i32) -> (i32, i32) {
    %c0_i32 = arith.constant 0 : i32
    %c0_i32_0 = arith.constant 0 : i32
    %c0_i32_1 = arith.constant 0 : i32
    return %c0_i32, %c0_i32_0 : i32, i32
  }
  func.func @transform_12(%arg0: i32) -> (i32, i32) {
    %c0_i32 = arith.constant 0 : i32
    %c0_i32_0 = arith.constant 0 : i32
    %c0_i32_1 = arith.constant 0 : i32
    return %c0_i32, %c0_i32_0 : i32, i32
  }
  func.func @transform_13(%arg0: i32) -> (i32, i32) {
    %c0_i32 = arith.constant 0 : i32
    %c0_i32_0 = arith.constant 0 : i32
    %c0_i32_1 = arith.constant 0 : i32
    return %c0_i32, %c0_i32_0 : i32, i32
  }
  func.func @transform_14(%arg0: i32) -> (i32, i32) {
    %c0_i32 = arith.constant 0 : i32
    %c0_i32_0 = arith.constant 0 : i32
    %c0_i32_1 = arith.constant 0 : i32
    return %c0_i32, %c0_i32_0 : i32, i32
  }
  func.func @transform_15(%arg0: i32) -> (i32, i32) {
    %c0_i32 = arith.constant 0 : i32
    %c0_i32_0 = arith.constant 0 : i32
    %c0_i32_1 = arith.constant 0 : i32
    return %c0_i32, %c0_i32_0 : i32, i32
  }
  func.func @transform_16(%arg0: i32) -> (i32, i32) {
    %c0_i32 = arith.constant 0 : i32
    %c0_i32_0 = arith.constant 0 : i32
    %c0_i32_1 = arith.constant 0 : i32
    return %c0_i32, %c0_i32_0 : i32, i32
  }
  func.func @transform_17(%arg0: i32) -> (i32, i32) {
    %c0_i32 = arith.constant 0 : i32
    %c0_i32_0 = arith.constant 0 : i32
    %c0_i32_1 = arith.constant 0 : i32
    return %c0_i32, %c0_i32_0 : i32, i32
  }
  func.func @transform_18(%arg0: i32) -> (i32, i32) {
    %c0_i32 = arith.constant 0 : i32
    %c0_i32_0 = arith.constant 0 : i32
    %c0_i32_1 = arith.constant 0 : i32
    return %c0_i32, %c0_i32_0 : i32, i32
  }
  func.func @transform_19(%arg0: i32) -> (i32, i32) {
    %c0_i32 = arith.constant 0 : i32
    %c0_i32_0 = arith.constant 0 : i32
    %c0_i32_1 = arith.constant 0 : i32
    return %c0_i32, %c0_i32_0 : i32, i32
  }
  func.func @transform_20(%arg0: i32) -> (i32, i32) {
    %c0_i32 = arith.constant 0 : i32
    %c0_i32_0 = arith.constant 0 : i32
    %c0_i32_1 = arith.constant 0 : i32
    return %c0_i32, %c0_i32_0 : i32, i32
  }
  func.func @transform_21(%arg0: i32) -> (i32, i32) {
    %c0_i32 = arith.constant 0 : i32
    %c0_i32_0 = arith.constant 0 : i32
    %c0_i32_1 = arith.constant 0 : i32
    return %c0_i32, %c0_i32_0 : i32, i32
  }
  func.func @transform_22(%arg0: i32) -> (i32, i32) {
    %c0_i32 = arith.constant 0 : i32
    %c0_i32_0 = arith.constant 0 : i32
    %c0_i32_1 = arith.constant 0 : i32
    return %c0_i32, %c0_i32_0 : i32, i32
  }
  func.func @transform_23(%arg0: i32) -> (i32, i32) {
    %c0_i32 = arith.constant 0 : i32
    %c0_i32_0 = arith.constant 0 : i32
    %c0_i32_1 = arith.constant 0 : i32
    return %c0_i32, %c0_i32_0 : i32, i32
  }
  func.func @transform_24(%arg0: i32) -> (i32, i32) {
    %c0_i32 = arith.constant 0 : i32
    %c0_i32_0 = arith.constant 0 : i32
    %c0_i32_1 = arith.constant 0 : i32
    return %c0_i32, %c0_i32_0 : i32, i32
  }
  func.func @transform_25(%arg0: i32) -> (i32, i32, i32) {
    %c0_i32 = arith.constant 0 : i32
    %c0_i32_0 = arith.constant 0 : i32
    %c0_i32_1 = arith.constant 0 : i32
    return %arg0, %c0_i32, %c0_i32_0 : i32, i32, i32
  }
  func.func @transform_26(%arg0: i32) -> (i32, i32, i32) {
    %c0_i32 = arith.constant 0 : i32
    %c0_i32_0 = arith.constant 0 : i32
    %c0_i32_1 = arith.constant 0 : i32
    return %arg0, %c0_i32, %c0_i32_0 : i32, i32, i32
  }
}

</mosaic_0001>

<bundles_post_ra>
// kernel: tpu_custom_call.1
= control target key start
LH: loop header
LB: loop body
LE: loop exit
PB: predicated region body
PF: predicated region fallthrough
CT: control target
= control target key end

     0   :  { %s6442_s0 = inlined_call_operand.vmem [shape: f32[64,64], index: 0, kind: input, shape index: {}]   ;;  %s6443_s1 = inlined_call_operand.hbm [shape: f32[32,32], index: 1, kind: input, shape index: {}]   ;;  %s6444_s2 = inlined_call_operand.hbm [shape: f32[16,16], index: 2, kind: input, shape index: {}]   ;;  %s6445_s3 = inlined_call_operand.vmem [shape: f32[64,64], index: 3, kind: input, shape index: {}]   ;;  %s6446_s4 = inlined_call_operand.hbm [shape: f32[32,32], index: 4, kind: input, shape index: {}]   ;;  %s6447_s5 = inlined_call_operand.hbm [shape: f32[16,16], index: 5, kind: input, shape index: {}]   ;;  %s6448_s6 = inlined_call_operand.vmem [shape: f32[96,96], index: 6, kind: input, shape index: {}]   ;;  %s6449_s7 = inlined_call_operand.vmem [shape: f32[48,48], index: 7, kind: input, shape index: {}]   ;;  %s6450_s8 = inlined_call_operand.hbm [shape: f32[24,24], index: 8, kind: input, shape index: {}]   ;;  %s6451_s9 = inlined_call_operand.vmem [shape: f32[96,96], index: 9, kind: input, shape index: {}]   ;;  %s6452_s10 = inlined_call_operand.vmem [shape: f32[48,48], index: 10, kind: input, shape index: {}]   ;;  %s6453_s11 = inlined_call_operand.hbm [shape: f32[24,24], index: 11, kind: input, shape index: {}]   ;;  %s6454_s12 = inlined_call_operand.vmem [shape: f32[96,32], index: 12, kind: input, shape index: {}]   ;;  %s6455_s13 = inlined_call_operand.vmem [shape: f32[48,16], index: 13, kind: input, shape index: {}]   ;;  %s6456_s14 = inlined_call_operand.vmem [shape: f32[24,8], index: 14, kind: input, shape index: {}]   ;;  %s6457_s15 = inlined_call_operand.vmem [shape: f32[32,64], index: 15, kind: input, shape index: {}]   ;;  %s6458_s16 = inlined_call_operand.hbm [shape: f32[16,32], index: 16, kind: input, shape index: {}]   ;;  %s6459_s17 = inlined_call_operand.vmem [shape: f32[96,48], index: 17, kind: input, shape index: {}]   ;;  %s6460_s18 = inlined_call_operand.vmem [shape: f32[48,24], index: 18, kind: input, shape index: {}]   ;;  %s6461_s19 = inlined_call_operand.vmem [shape: f32[32,16], index: 19, kind: input, shape index: {}]   ;;  %s6462_s20 = inlined_call_operand.vmem [shape: f32[32,8], index: 20, kind: input, shape index: {}]   ;;  %s6463_s21 = inlined_call_operand.hbm [shape: f32[16,32], index: 21, kind: input, shape index: {}]   ;;  %s6464_s22 = inlined_call_operand.hbm [shape: f32[8,32], index: 22, kind: input, shape index: {}]   ;;  %s6465_s23 = inlined_call_operand.vmem [shape: f32[32,32], index: 23, kind: input, shape index: {}]   ;;  %s6466_s24 = inlined_call_operand.hbm [shape: f32[32,32], index: 24, kind: input, shape index: {}]   ;;  %s6467_s25 = inlined_call_operand.vmem [shape: f32[2,64,96], index: 25, kind: input, shape index: {}]   ;;  %s6468_s26 = inlined_call_operand.hbm [shape: f32[2,1,128], index: 26, kind: output, shape index: {}]  }
   0x1   :  { %6505 = sst [smem:[#allocation35_spill]] %s6442_s0 }
   0x2   :  { %6506 = sst [smem:[#allocation36_spill]] %s6443_s1 }
   0x3   :  { %6507 = sst [smem:[#allocation37_spill]] %s6444_s2 }
   0x4   :  { %6508 = sst [smem:[#allocation38_spill]] %s6445_s3 }
   0x5   :  { %6509 = sst [smem:[#allocation39_spill]] %s6446_s4 }
   0x6   :  { %6510 = sst [smem:[#allocation40_spill]] %s6447_s5 }
   0x7   :  { %6511 = sst [smem:[#allocation41_spill]] %s6448_s6 }
   0x8   :  { %6512 = sst [smem:[#allocation42_spill]] %s6449_s7 }
   0x9   :  { %6513 = sst [smem:[#allocation43_spill]] %s6450_s8 }
   0xa   :  { %6514 = sst [smem:[#allocation44_spill]] %s6451_s9 }
   0xb   :  { %6515 = sst [smem:[#allocation45_spill]] %s6452_s10 }
   0xc   :  { %6516 = sst [smem:[#allocation46_spill]] %s6453_s11 }
   0xd   :  { %6517 = sst [smem:[#allocation47_spill]] %s6456_s14 }
   0xe   :  { %6518 = sst [smem:[#allocation48_spill]] %s6460_s18 }
   0xf   :  { %6519 = sst [smem:[#allocation49_spill]] %s6462_s20 }
  0x10   :  { %6520 = sst [smem:[#allocation50_spill]] %s6463_s21 }
  0x11   :  { %6521 = sst [smem:[#allocation51_spill]] %s6465_s23 }
  0x12   :  { %6522 = sst [smem:[#allocation52_spill]] %s6468_s26 }
  0x13   :  { %31 = vsyncpa [#allocation3], 0 }
  0x14   :  { %32 = vsyncpa [#allocation6], 0 }
  0x15   :  { %33 = vsyncpa [#allocation9], 0 }
  0x16   :  { %34 = vsyncpa [#allocation12], 0 }
  0x17   :  { %35 = vsyncpa [#allocation15], 0 }
  0x18   :  { %36 = vsyncpa [#allocation18], 0 }
  0x19   :  { %37 = vsyncpa [#allocation4], 0 }
  0x1a   :  { %39 = vsyncpa [#allocation4 + $0x1], 0  ;;  %s5547_s27 = smov 0   ;;  %s5549_s3 = smov 0  }
  0x1b   :  { %s5551_s7 = smov 0   ;;  %s5553_s28 = smov 0  }
  0x1c LB: > { %6523 = sst [smem:[#allocation27_spill]] %s5382_s27  ;;  %s5568_s8 = sadd.s32 4294967295, %s5394_s28   ;;  %s5394_s28 = sphi %s5553_s28, %s6579_s28   ;;  %s5390_s7 = sphi %s5551_s7, %s6582_s7   ;;  %s5386_s3 = sphi %s5549_s3, %s6581_s3   ;;  %s5382_s27 = sphi %s5547_s27, %s6580_s27  }
  0x1d   : > { %6524 = sst [smem:[#allocation28_spill]] %s5386_s3  ;;  %s3803_s4 = sadd.s32 4294967294, %s5394_s28  }
  0x1e   : > { %6525 = sst [smem:[#allocation29_spill]] %s5390_s7  ;;  %s5572_s29 = sadd.s32 1, %s5394_s28  }
  0x1f   : > { %6526 = sst [smem:[#allocation30_spill]] %s5394_s28  ;;  %s603_s0 = sadd.s32 1, %s5390_s7 }
  0x20   : > { %6527 = sst [smem:[#allocation31_spill]] %s5572_s29  ;;  %s600_s9 = ssub.s32 %s5394_s28, %s5572_s29 }
  0x21   : > { %p613_p0 = scmp.ne.s32.totalorder %s5390_s7, %s5386_s3  ;;  %p601_p1 = scmp.eq.s32.totalorder %s600_s9, 0 }
  0x22   : > { %p614_p2 = scmp.eq.s32.totalorder %s5568_s8, 1  ;;  %p619_p3 = scmp.ne.s32.totalorder %s5386_s3, %s5382_s27 }
  0x23   : > { %p620_p4 = scmp.eq.s32.totalorder %s3803_s4, 1  ;;  %p3804_p7 = scmp.ge.s32.totalorder %s5394_s28, 1 }
  0x24   : > { %s5583_s30 = scalar_select %p601_p1, %s5390_s7, %s603_s0  }
  0x25   : > { %p5585_p5 = por %p614_p2, %p613_p0  ;;  %p5589_p6 = por %p620_p4, %p619_p3 }
  0x26   : > { %6528 = sst [smem:[#allocation32_spill]] %s5583_s30  ;;  %p627_p8 = scmp.lt.s32.totalorder %s5394_s28, 3 }
  0x27   : > { %s6529_s2 = scalar_select %p5585_p5, 1, 0 }
  0x28   : > { %s6531_s5 = scalar_select %p5589_p6, 1, 0 }
  0x29   : > { %6530 = sst [smem:[#allocation33_spill]] %s6529_s2  ;;  %p6490_p9 = scmp.eq.s32.totalorder %s5568_s8, 0 }
  0x2a   : > { %6532 = sst [smem:[#allocation34_spill]] %s6531_s5  ;;  %p5596_p10 = pnand %p3804_p7, %p627_p8 }
  0x2b   : > { %s5396_s6 = smov [#allocation5]   ;;  %s5397_s0 = smov [#allocation8]  }
  0x2c   : > { %s6533_s10 = scalar_select %p5596_p10, 1, 0 }
  0x2d   : > { %p4897_p11 = pneg %p5596_p10  ;;  %s655_s1 = sshll.u32 %s5396_s6, 4  ;;  %s5602_s1 = int_to_ptr.vmem [resolvable:$true] %s655_s1 }
  0x2e   : > { %s684_s9 = sshll.u32 %s5397_s0, 4  ;;  %s5398_s30 = smov [#allocation11]   ;;  %s5610_s9 = int_to_ptr.vmem [resolvable:$true] %s684_s9 }
  0x2f   : > { %p5606_p12 = pnand %p6490_p9, %p4897_p11  ;;  %s5612_s7 = sshll.u32 %s5398_s30, 4  ;;  %s723_s7 = int_to_ptr.vmem [resolvable:$true] %s5612_s7 }
  0x30   : > { %s6535_s27 = sld [smem:[#allocation37_spill]] }
  0x31   : > { %p5622_p0 = pneg %p5606_p12 }
  0x36   : > { %s6536_s26 = smov %s6535_s27  ;;  %s5028_s28 = scalar_lea.hbm %s6535_s27, 256 }
  0x37   : > { %p5029_p13 = scmp.ne.s32.totalorder %s6536_s26, %s5028_s28  ;;  %p5035_p3 = scmp.lt.u32.totalorder %s5028_s28, %s6536_s26 }
  0x39   : > { %p5031_p1 = pnand %p5622_p0, %p5029_p13 }
  0x3b   : > { %p5032_p2 = pneg %p5031_p1 }
  0x3d   : > { %p5037_p4 = pnand %p5035_p3, %p5032_p2 }
  0x3f   : > { %5040 = shalt.err (!%p5037_p4)
}
  0x40   : > { %s5041_s27 = scalar_lea.vmem %s5602_s1, 256  ;;  %p5049_p9 = scmp.lt.s32.totalorder %s5602_s1, %s5602_s1 }
  0x41   : > { %p5042_p7 = scmp.ne.s32.totalorder %s5602_s1, %s5041_s27  ;;  %p5050_p6 = scmp.lt.s32.totalorder %s5041_s27, %s5041_s27 }
  0x43   : > { %p5044_p8 = pnand %p5042_p7, %p5622_p0  ;;  %p5051_p13 = por %p5050_p6, %p5049_p9 }
  0x45   : > { %p5045_p11 = pneg %p5044_p8 }
  0x47   : > { %p5052_p1 = pnand %p5051_p13, %p5045_p11 }
  0x49   : > { %5055 = shalt.err (!%p5052_p1)
}
  0x4a   : > { %s5399_s29 = smov 128   ;;  %s5400_s28 = smov 8  }
  0x4b   : > { %4903 = dma.hbm_to_vmem [thread:$0]  (!%p5606_p12), %s6536_s26, 256, %s5602_s1, [#allocation6], %s5399_s29, %s5399_s29, %s5400_s28  }
  0x4c   : > { %s6538_s30 = sld [smem:[#allocation40_spill]] }
  0x52   : > { %s5056_s27 = scalar_lea.hbm %s6538_s30, 256 }
  0x53   : > { %p5057_p6 = scmp.ne.s32.totalorder %s6538_s30, %s5056_s27  ;;  %p5063_p3 = scmp.lt.u32.totalorder %s5056_s27, %s6538_s30 }
  0x55   : > { %p5059_p9 = pnand %p5057_p6, %p5622_p0 }
  0x57   : > { %p5060_p2 = pneg %p5059_p9 }
  0x59   : > { %p5065_p4 = pnand %p5063_p3, %p5060_p2 }
  0x5b   : > { %5068 = shalt.err (!%p5065_p4)
}
  0x5c   : > { %s5069_s1 = scalar_lea.vmem %s5610_s9, 256  ;;  %p5077_p13 = scmp.lt.s32.totalorder %s5610_s9, %s5610_s9 }
  0x5d   : > { %p5070_p7 = scmp.ne.s32.totalorder %s5610_s9, %s5069_s1  ;;  %p5078_p1 = scmp.lt.s32.totalorder %s5069_s1, %s5069_s1 }
  0x5f   : > { %p5072_p8 = pnand %p5070_p7, %p5622_p0  ;;  %p5079_p6 = por %p5078_p1, %p5077_p13 }
  0x61   : > { %p5073_p11 = pneg %p5072_p8 }
  0x63   : > { %p5080_p9 = pnand %p5079_p6, %p5073_p11 }
  0x65   : > { %5083 = shalt.err (!%p5080_p9)
}
  0x66   : > { %4909 = dma.hbm_to_vmem [thread:$0]  (!%p5606_p12), %s6538_s30, 256, %s5610_s9, [#allocation9], %s5399_s29, %s5399_s29, %s5400_s28  }
  0x67   : > { %s6539_s11 = sld [smem:[#allocation46_spill]] }
  0x6d   : > { %s5084_s2 = scalar_lea.hbm %s6539_s11, 384 }
  0x6e   : > { %p5085_p2 = scmp.ne.s32.totalorder %s6539_s11, %s5084_s2  ;;  %p5091_p7 = scmp.lt.u32.totalorder %s5084_s2, %s6539_s11 }
  0x70   : > { %p5087_p3 = pnand %p5085_p2, %p5622_p0 }
  0x72   : > { %p5088_p4 = pneg %p5087_p3 }
  0x74   : > { %p5093_p8 = pnand %p5091_p7, %p5088_p4 }
  0x76   : > { %5096 = shalt.err (!%p5093_p8)
}
  0x77   : > { %s5097_s1 = scalar_lea.vmem %s723_s7, 384  ;;  %p5105_p6 = scmp.lt.s32.totalorder %s723_s7, %s723_s7 }
  0x78   : > { %p5098_p11 = scmp.ne.s32.totalorder %s723_s7, %s5097_s1  ;;  %p5106_p9 = scmp.lt.s32.totalorder %s5097_s1, %s5097_s1 }
  0x7a   : > { %p5100_p13 = pnand %p5098_p11, %p5622_p0  ;;  %p5107_p5 = por %p5106_p9, %p5105_p6 }
  0x7c   : > { %p5101_p1 = pneg %p5100_p13 }
  0x7e   : > { %p5108_p10 = pnand %p5107_p5, %p5101_p1 }
  0x80   : > { %5111 = shalt.err (!%p5108_p10)
}
  0x81   : > { %4915 = dma.hbm_to_vmem [thread:$0]  (!%p5606_p12), %s6539_s11, 384, %s723_s7, [#allocation12], %s5399_s29, %s5399_s29, %s5400_s28  }
  0x82   : > { %s5401_s18 = smov [#allocation14]   ;;  %s5402_s23 = smov [#allocation2]  }
  0x83   : > { %s772_s20 = sshll.u32 %s5401_s18, 4  ;;  %s642_s2 = sshll.u32 %s5402_s23, 4  ;;  %s773_s20 = int_to_ptr.vmem [resolvable:$true] %s772_s20  ;;  %s643_s2 = int_to_ptr.vmem [resolvable:$true] %s642_s2 }
  0x84   : > { %s6540_s21 = sld [smem:[#allocation50_spill]] }
  0x8a   : > { %s5112_s0 = scalar_lea.hbm %s6540_s21, 256 }
  0x8b   : > { %p5113_p5 = scmp.ne.s32.totalorder %s6540_s21, %s5112_s0  ;;  %p5119_p3 = scmp.lt.u32.totalorder %s5112_s0, %s6540_s21 }
  0x8d   : > { %p5115_p10 = pnand %p5113_p5, %p5622_p0 }
  0x8f   : > { %p5116_p2 = pneg %p5115_p10 }
  0x91   : > { %p5121_p4 = pnand %p5119_p3, %p5116_p2 }
  0x93   : > { %5124 = shalt.err (!%p5121_p4)
}
  0x94   : > { %s5125_s7 = scalar_lea.vmem %s773_s20, 256  ;;  %p5133_p13 = scmp.lt.s32.totalorder %s773_s20, %s773_s20 }
  0x95   : > { %p5126_p7 = scmp.ne.s32.totalorder %s773_s20, %s5125_s7  ;;  %p5134_p1 = scmp.lt.s32.totalorder %s5125_s7, %s5125_s7 }
  0x97   : > { %p5128_p8 = pnand %p5126_p7, %p5622_p0  ;;  %p5135_p6 = por %p5134_p1, %p5133_p13 }
  0x99   : > { %p5129_p11 = pneg %p5128_p8 }
  0x9b   : > { %p5136_p9 = pnand %p5135_p6, %p5129_p11 }
  0x9d   : > { %5139 = shalt.err (!%p5136_p9)
}
  0x9e   : > { %4921 = dma.hbm_to_vmem [thread:$0]  (!%p5606_p12), %s6540_s21, 256, %s773_s20, [#allocation15], %s5399_s29, %s5399_s29, %s5400_s28  }
  0x9f   : > { %s6541_s5 = sld [smem:[#allocation36_spill]] }
  0xa5   : > { %s5140_s6 = scalar_lea.hbm %s6541_s5, 512 }
  0xa6   : > { %p5141_p5 = scmp.ne.s32.totalorder %s6541_s5, %s5140_s6  ;;  %p5147_p3 = scmp.lt.u32.totalorder %s5140_s6, %s6541_s5 }
  0xa8   : > { %p5143_p10 = pnand %p5141_p5, %p5622_p0 }
  0xaa   : > { %p5144_p2 = pneg %p5143_p10 }
  0xac   : > { %p5149_p4 = pnand %p5147_p3, %p5144_p2 }
  0xae   : > { %5152 = shalt.err (!%p5149_p4)
}
  0xaf   : > { %s5153_s7 = scalar_lea.vmem %s643_s2, 512  ;;  %p5161_p13 = scmp.lt.s32.totalorder %s643_s2, %s643_s2 }
  0xb0   : > { %p5154_p7 = scmp.ne.s32.totalorder %s643_s2, %s5153_s7  ;;  %p5162_p1 = scmp.lt.s32.totalorder %s5153_s7, %s5153_s7 }
  0xb2   : > { %p5156_p8 = pnand %p5154_p7, %p5622_p0  ;;  %p5163_p6 = por %p5162_p1, %p5161_p13 }
  0xb4   : > { %p5157_p11 = pneg %p5156_p8 }
  0xb6   : > { %p5164_p9 = pnand %p5163_p6, %p5157_p11 }
  0xb8   : > { %5167 = shalt.err (!%p5164_p9)
}
  0xb9   : > { %4900 = dma.hbm_to_vmem [thread:$0]  (!%p5606_p12), %s6541_s5, 512, %s643_s2, [#allocation3], %s5399_s29, %s5399_s29, %s5400_s28  }
  0xba   : > { %s5403_s14 = smov [#allocation7]   ;;  %s5404_s23 = smov [#allocation10]  }
  0xbb   : > { %s671_s18 = sshll.u32 %s5403_s14, 4  ;;  %s703_s6 = sshll.u32 %s5404_s23, 4  ;;  %s672_s18 = int_to_ptr.vmem [resolvable:$true] %s671_s18  ;;  %s704_s6 = int_to_ptr.vmem [resolvable:$true] %s703_s6 }
  0xbc   : > { %s6542_s1 = sld [smem:[#allocation39_spill]] }
  0xc2   : > { %s5168_s9 = scalar_lea.hbm %s6542_s1, 512 }
  0xc3   : > { %p5169_p5 = scmp.ne.s32.totalorder %s6542_s1, %s5168_s9  ;;  %p5175_p3 = scmp.lt.u32.totalorder %s5168_s9, %s6542_s1 }
  0xc5   : > { %p5171_p10 = pnand %p5169_p5, %p5622_p0 }
  0xc7   : > { %p5172_p2 = pneg %p5171_p10 }
  0xc9   : > { %p5177_p4 = pnand %p5175_p3, %p5172_p2 }
  0xcb   : > { %5180 = shalt.err (!%p5177_p4)
}
  0xcc   : > { %s5181_s2 = scalar_lea.vmem %s672_s18, 512  ;;  %p5189_p13 = scmp.lt.s32.totalorder %s672_s18, %s672_s18 }
  0xcd   : > { %p5182_p7 = scmp.ne.s32.totalorder %s672_s18, %s5181_s2  ;;  %p5190_p1 = scmp.lt.s32.totalorder %s5181_s2, %s5181_s2 }
  0xcf   : > { %p5184_p8 = pnand %p5182_p7, %p5622_p0  ;;  %p5191_p6 = por %p5190_p1, %p5189_p13 }
  0xd1   : > { %p5185_p11 = pneg %p5184_p8 }
  0xd3   : > { %p5192_p9 = pnand %p5191_p6, %p5185_p11 }
  0xd5   : > { %5195 = shalt.err (!%p5192_p9)
}
  0xd6   : > { %4906 = dma.hbm_to_vmem [thread:$0]  (!%p5606_p12), %s6542_s1, 512, %s672_s18, [#allocation6], %s5399_s29, %s5399_s29, %s5400_s28  }
  0xd7   : > { %s6543_s23 = sld [smem:[#allocation43_spill]] }
  0xdd   : > { %s5196_s0 = scalar_lea.hbm %s6543_s23, 384 }
  0xde   : > { %p5197_p5 = scmp.ne.s32.totalorder %s6543_s23, %s5196_s0  ;;  %p5203_p3 = scmp.lt.u32.totalorder %s5196_s0, %s6543_s23 }
  0xe0   : > { %p5199_p10 = pnand %p5197_p5, %p5622_p0 }
  0xe2   : > { %p5200_p2 = pneg %p5199_p10 }
  0xe4   : > { %p5205_p4 = pnand %p5203_p3, %p5200_p2 }
  0xe6   : > { %5208 = shalt.err (!%p5205_p4)
}
  0xe7   : > { %s5209_s2 = scalar_lea.vmem %s704_s6, 384  ;;  %p5217_p13 = scmp.lt.s32.totalorder %s704_s6, %s704_s6 }
  0xe8   : > { %p5210_p7 = scmp.ne.s32.totalorder %s704_s6, %s5209_s2  ;;  %p5218_p1 = scmp.lt.s32.totalorder %s5209_s2, %s5209_s2 }
  0xea   : > { %p5212_p8 = pnand %p5210_p7, %p5622_p0  ;;  %p5219_p6 = por %p5218_p1, %p5217_p13 }
  0xec   : > { %p5213_p11 = pneg %p5212_p8 }
  0xee   : > { %p5220_p9 = pnand %p5219_p6, %p5213_p11 }
  0xf0   : > { %5223 = shalt.err (!%p5220_p9)
}
  0xf1   : > { %4912 = dma.hbm_to_vmem [thread:$0]  (!%p5606_p12), %s6543_s23, 384, %s704_s6, [#allocation9], %s5399_s29, %s5399_s29, %s5400_s28  }
  0xf2   : > { %s5405_s21 = smov [#allocation13]   ;;  %s5406_s14 = smov [#allocation16]  }
  0xf3   : > { %s747_s26 = sshll.u32 %s5405_s21, 4  ;;  %s786_s0 = sshll.u32 %s5406_s14, 4  ;;  %s748_s26 = int_to_ptr.vmem [resolvable:$true] %s747_s26  ;;  %s787_s0 = int_to_ptr.vmem [resolvable:$true] %s786_s0 }
  0xf4   : > { %s5224_s7 = scalar_lea.hbm %s6458_s16, 256 }
  0xf5   : > { %p5225_p5 = scmp.ne.s32.totalorder %s6458_s16, %s5224_s7  ;;  %p5231_p3 = scmp.lt.u32.totalorder %s5224_s7, %s6458_s16 }
  0xf7   : > { %p5227_p10 = pnand %p5225_p5, %p5622_p0 }
  0xf9   : > { %p5228_p2 = pneg %p5227_p10 }
  0xfb   : > { %p5233_p4 = pnand %p5231_p3, %p5228_p2 }
  0xfd   : > { %5236 = shalt.err (!%p5233_p4)
}
  0xfe   : > { %s5237_s6 = scalar_lea.vmem %s748_s26, 256  ;;  %p5245_p13 = scmp.lt.s32.totalorder %s748_s26, %s748_s26 }
  0xff   : > { %p5238_p7 = scmp.ne.s32.totalorder %s748_s26, %s5237_s6  ;;  %p5246_p1 = scmp.lt.s32.totalorder %s5237_s6, %s5237_s6 }
 0x101   : > { %p5240_p8 = pnand %p5238_p7, %p5622_p0  ;;  %p5247_p6 = por %p5246_p1, %p5245_p13 }
 0x103   : > { %p5241_p11 = pneg %p5240_p8 }
 0x105   : > { %p5248_p9 = pnand %p5247_p6, %p5241_p11 }
 0x107   : > { %5251 = shalt.err (!%p5248_p9)
}
 0x108   : > { %4918 = dma.hbm_to_vmem [thread:$0]  (!%p5606_p12), %s6458_s16, 256, %s748_s26, [#allocation12], %s5399_s29, %s5399_s29, %s5400_s28  }
 0x109   : > { %s5252_s27 = scalar_lea.hbm %s6464_s22, 128 }
 0x10a   : > { %p5253_p5 = scmp.ne.s32.totalorder %s6464_s22, %s5252_s27  ;;  %p5259_p3 = scmp.lt.u32.totalorder %s5252_s27, %s6464_s22 }
 0x10c   : > { %p5255_p10 = pnand %p5253_p5, %p5622_p0 }
 0x10e   : > { %p5256_p2 = pneg %p5255_p10 }
 0x110   : > { %p5261_p4 = pnand %p5259_p3, %p5256_p2 }
 0x112   : > { %5264 = shalt.err (!%p5261_p4)
}
 0x113   : > { %s5265_s18 = scalar_lea.vmem %s787_s0, 128  ;;  %p5273_p13 = scmp.lt.s32.totalorder %s787_s0, %s787_s0 }
 0x114   : > { %p5266_p7 = scmp.ne.s32.totalorder %s787_s0, %s5265_s18  ;;  %p5274_p1 = scmp.lt.s32.totalorder %s5265_s18, %s5265_s18 }
 0x116   : > { %p5268_p8 = pnand %p5266_p7, %p5622_p0  ;;  %p5275_p6 = por %p5274_p1, %p5273_p13 }
 0x118   : > { %p5269_p11 = pneg %p5268_p8 }
 0x11a   : > { %p5276_p9 = pnand %p5275_p6, %p5269_p11 }
 0x11c   : > { %5279 = shalt.err (!%p5276_p9)
}
 0x11d   : > { %4924 = dma.hbm_to_vmem [thread:$0]  (!%p5606_p12), %s6464_s22, 128, %s787_s0, [#allocation15]  }
 0x11e   : > { %s5407_s1 = smov [#allocation17]   ;;  %s5280_s27 = scalar_lea.hbm %s6466_s24, 512 }
 0x11f   : > { %s799_s11 = sshll.u32 %s5407_s1, 4  ;;  %p5281_p5 = scmp.ne.s32.totalorder %s6466_s24, %s5280_s27  ;;  %s800_s11 = int_to_ptr.vmem [resolvable:$true] %s799_s11 }
 0x120   : > { %p5287_p3 = scmp.lt.u32.totalorder %s5280_s27, %s6466_s24 }
 0x121   : > { %p5283_p10 = pnand %p5281_p5, %p5622_p0 }
 0x123   : > { %p5284_p2 = pneg %p5283_p10 }
 0x125   : > { %p5289_p4 = pnand %p5287_p3, %p5284_p2 }
 0x127   : > { %5292 = shalt.err (!%p5289_p4)
}
 0x128   : > { %s5293_s0 = scalar_lea.vmem %s800_s11, 512  ;;  %p5301_p13 = scmp.lt.s32.totalorder %s800_s11, %s800_s11 }
 0x129   : > { %p5294_p7 = scmp.ne.s32.totalorder %s800_s11, %s5293_s0  ;;  %p5302_p1 = scmp.lt.s32.totalorder %s5293_s0, %s5293_s0 }
 0x12b   : > { %p5296_p8 = pnand %p5294_p7, %p5622_p0  ;;  %p5303_p6 = por %p5302_p1, %p5301_p13 }
 0x12d   : > { %p5297_p11 = pneg %p5296_p8 }
 0x12f   : > { %p5304_p9 = pnand %p5303_p6, %p5297_p11 }
 0x131   : > { %5307 = shalt.err (!%p5304_p9)
}
 0x132   : > { %4927 = dma.hbm_to_vmem [thread:$0]  (!%p5606_p12), %s6466_s24, 512, %s800_s11, [#allocation18], %s5399_s29, %s5399_s29, %s5400_s28  }
 0x133   : > { %p6544_p5 = scmp.ne.s32.totalorder %s6533_s10, 0 }
 0x134   : > { %p6545_p0 = scmp.eq.s32.totalorder (!%p6544_p5), %s5568_s8, 0 }
 0x135   : > { %823 = sbr.rel (%p6544_p5) target bundleno = 4665 (0x1239), region = 124 }
 0x13c   : > { %5353 = dma.done.wait (%p6545_p0), [#allocation3], 512   ;;  %p6546_p10 = pmov %p6545_p0 }
 0x13d   : > { %p6547_p2 = pmov %p6545_p0 }
 0x13e   : > { %5355 = vsyncadd (%p6546_p10), [#allocation3], 4294966784 }
 0x13f   : > { %5357 = dma.done.wait (%p6547_p2), [#allocation6], 768   ;;  %p6548_p3 = pmov %p6545_p0 }
 0x140   : > { %p6549_p4 = pmov %p6545_p0 }
 0x141   : > { %5359 = vsyncadd (%p6548_p3), [#allocation6], 4294966528 }
 0x142   : > { %5361 = dma.done.wait (%p6549_p4), [#allocation9], 640   ;;  %p6550_p12 = pmov %p6545_p0 }
 0x143   : > { %p6551_p7 = pmov %p6545_p0 }
 0x144   : > { %5363 = vsyncadd (%p6550_p12), [#allocation9], 4294966656 }
 0x145   : > { %5365 = dma.done.wait (%p6551_p7), [#allocation12], 640   ;;  %p6552_p8 = pmov %p6545_p0 }
 0x146   : > { %p6553_p11 = pmov %p6545_p0 }
 0x147   : > { %5367 = vsyncadd (%p6552_p8), [#allocation12], 4294966656 }
 0x148   : > { %5369 = dma.done.wait (%p6553_p11), [#allocation15], 384   ;;  %p6554_p13 = pmov %p6545_p0 }
 0x149   : > { %p6555_p1 = pmov %p6545_p0 }
 0x14a   : > { %5371 = vsyncadd (%p6554_p13), [#allocation15], 4294966912 }
 0x14b   : > { %5373 = dma.done.wait (%p6555_p1), [#allocation18], 512   ;;  %p6556_p6 = pmov %p6545_p0 }
 0x14c   : > { %p928_p9 = scmp.lt.s32.totalorder %s5568_s8, 1  ;;  %s6557_s28 = sld [smem:[#allocation44_spill]]  ;;  %vm961_vm0 = vcmask 785408   ;;  %vm1091_vm1 = vcmask 523264   ;;  %vm1795_vm10 = vcmask 392192   ;;  %vm1893_vm11 = vcmask 261120  }
 0x14d   : > { %5375 = vsyncadd (%p6556_p6), [#allocation18], 4294966784  ;;  %s6559_s26 = sld [smem:[#allocation35_spill]]  ;;  %s6561_s9 = sld [smem:[#allocation38_spill]] }
 0x14e   : > { %s929_s3 = scalar_select %p928_p9, %s5568_s8, 1 }
 0x14f   : > { %s6562_s4 = sld [smem:[#allocation45_spill]]  ;;  %s6569_s18 = sld [smem:[#allocation49_spill]] }
 0x150   : > { %s3931_s10 = sshll.u32 %s929_s3, 6  ;;  %s6563_s3 = sld [smem:[#allocation42_spill]] }
 0x151   : > { %s5881_s2 = scalar_lea.vmem %s6467_s25, %s3931_s10  ;;  %s6560_s10 = sld [smem:[#allocation41_spill]] }
 0x152   : > { %s6558_s6 = smov %s6557_s28  ;;  %v949_v0 = vld [vmem:[%s6557_s28] sm:$0xff]  ;;  %v5913_v19 = vld [vmem:[%s5881_s2 + $0x8] sm:$0xff]  ;;  %v5916_v20 = vld [vmem:[%s5881_s2 + $0x10] sm:$0xff]  ;;  %s6565_s28 = sld [smem:[#allocation48_spill]] }
 0x153   : > { %v950_v1 = vld [vmem:[%s6558_s6 + $0x8] sm:$0xff]  ;;  %v951_v2 = vld [vmem:[%s6558_s6 + $0x10] sm:$0xff]  ;;  %v952_v4 = vld [vmem:[%s6558_s6 + $0x18] sm:$0xff]  ;;  %s6570_s0 = sld [smem:[#allocation51_spill]]  ;;  %s6571_s7 = sld [smem:[#allocation28_spill]] }
 0x154   : > { %v4586_v3 = vpack.c.bf16 %v950_v1, %v949_v0  ;;  %v4590_v5 = vpack.c.bf16 %v952_v4, %v951_v2  ;;  %v953_v6 = vld [vmem:[%s6558_s6 + $0x20] sm:$0xff]  ;;  %v954_v7 = vld [vmem:[%s6558_s6 + $0x28] sm:$0xff]  ;;  %v955_v10 = vld [vmem:[%s6558_s6 + $0x30] sm:$0xff]  ;;  %s6572_s20 = sld [smem:[#allocation33_spill]]  ;;  %s3928_s21 = sshll.u32 %s5568_s8, 4 }
 0x155   : > { %v5890_v8 = vld [vmem:[%s5881_s2] sm:$0xff]  ;;  %v4594_v9 = vpack.c.bf16 %v954_v7, %v953_v6  ;;  %v956_v11 = vld [vmem:[%s6558_s6 + $0x38] sm:$0xff]  ;;  %v958_v14 = vld [vmem:[%s6558_s6 + $0x48] sm:$0xff]  ;;  %s5411_s8 = smov [#allocation19]  }
 0x156   : > { %4587 = vmatprep.subr.bf16.mxu0 %v4586_v3  ;;  %4190 = vmatprep.mubr.msk.f32.mxu0 %vm961_vm0, %v5890_v8  ;;  %v4598_v12 = vpack.c.bf16 %v956_v11, %v955_v10  ;;  %v957_v13 = vld [vmem:[%s6558_s6 + $0x40] sm:$0xff]  ;;  %v959_v16 = vld [vmem:[%s6558_s6 + $0x50] sm:$0xff]  ;;  %v960_v17 = vld [vmem:[%s6558_s6 + $0x58] sm:$0xff]  ;;  %s6564_s29 = smov %s6563_s3 }
 0x157   : > { %4589 = vmatpush3.bf16.msra.mxu0 %v4586_v3  ;;  %v4602_v15 = vpack.c.bf16 %v958_v14, %v957_v13  ;;  %v4606_v18 = vpack.c.bf16 %v960_v17, %v959_v16  ;;  %v5923_v21 = vld [vmem:[%s5881_s2 + $0x18] sm:$0xff]  ;;  %v5926_v22 = vld [vmem:[%s5881_s2 + $0x20] sm:$0xff]  ;;  %v5933_v23 = vld [vmem:[%s5881_s2 + $0x28] sm:$0xff] }
 0x158   : > { %4591 = vmatprep.subr.bf16.mxu0 %v4590_v5  ;;  %v5936_v24 = vld [vmem:[%s5881_s2 + $0x30] sm:$0xff]  ;;  %v5943_v25 = vld [vmem:[%s5881_s2 + $0x38] sm:$0xff]  ;;  %v941_v26 = vld [vmem:[%s6559_s26] sm:$0xff]  ;;  %s6566_s1 = smov %s6565_s28 }
 0x159   : > { %4218 = vmatprep.mubr.msk.f32.mxu1 %vm1091_vm1, %v941_v26  ;;  %v1229_v36 = vld [vmem:[%s6560_s10] sm:$0xff]  ;;  %v1230_v37 = vld [vmem:[%s6560_s10 + $0x8] sm:$0xff]  ;;  %v1231_v42 = vld [vmem:[%s6560_s10 + $0x10] sm:$0xff]  ;;  %s926_s2 = sand.u32 1, %s6571_s7   ;;  %s5312_s7 = sshll.u32 %s5411_s8, 4  ;;  %s5313_s7 = int_to_ptr.vmem [resolvable:$false] %s5312_s7 }
 0x15a   : > { %v4626_v41 = vpack.c.bf16 %v1230_v37, %v1229_v36  ;;  %v1232_v43 = vld [vmem:[%s6560_s10 + $0x18] sm:$0xff]  ;;  %v942_v44 = vld [vmem:[%s6559_s26 + $0x8] sm:$0xff]  ;;  %v943_v46 = vld [vmem:[%s6559_s26 + $0x10] sm:$0xff]  ;;  %s3638_s5 = scalar_lea.sflag [#allocation4], %s926_s2  ;;  %p6574_p0 = scmp.ne.s32.totalorder %s6572_s20, 0 }
 0x15b   : > { %4593 = vmatpush3.bf16.msra.mxu0 %v4590_v5  ;;  %v4630_v45 = vpack.c.bf16 %v1232_v43, %v1231_v42  ;;  %v1233_v47 = vld [vmem:[%s6560_s10 + $0x20] sm:$0xff]  ;;  %v1234_v48 = vld [vmem:[%s6560_s10 + $0x28] sm:$0xff]  ;;  %v944_v49 = vld [vmem:[%s6559_s26 + $0x18] sm:$0xff] }
 0x15c   : > { %4595 = vmatprep.subr.bf16.mxu0 %v4594_v9  ;;  %v4634_v50 = vpack.c.bf16 %v1234_v48, %v1233_v47  ;;  %v945_v51 = vld [vmem:[%s6559_s26 + $0x20] sm:$0xff]  ;;  %v1235_v52 = vld [vmem:[%s6560_s10 + $0x30] sm:$0xff]  ;;  %v1236_v53 = vld [vmem:[%s6560_s10 + $0x38] sm:$0xff] }
 0x15d   : > { %v946_v54 = vld [vmem:[%s6559_s26 + $0x28] sm:$0xff]  ;;  %v4638_v55 = vpack.c.bf16 %v1236_v53, %v1235_v52  ;;  %v947_v56 = vld [vmem:[%s6559_s26 + $0x30] sm:$0xff]  ;;  %v1237_v57 = vld [vmem:[%s6560_s10 + $0x40] sm:$0xff] }
 0x15e   : > { %v1238_v58 = vld [vmem:[%s6560_s10 + $0x48] sm:$0xff]  ;;  %v948_v59 = vld [vmem:[%s6559_s26 + $0x38] sm:$0xff]  ;;  %v1239_v61 = vld [vmem:[%s6560_s10 + $0x50] sm:$0xff] }
 0x15f   : > { %4597 = vmatpush3.bf16.msra.mxu0 %v4594_v9  ;;  %v4642_v60 = vpack.c.bf16 %v1238_v58, %v1237_v57  ;;  %v1240_v62 = vld [vmem:[%s6560_s10 + $0x58] sm:$0xff]  ;;  %v1221_v0 = vld [vmem:[%s6561_s9] sm:$0xff]  ;;  %v1677_v2 = vld [vmem:[%s6459_s17 + $0x8] sm:$0xff] }
 0x160   : > { %4599 = vmatprep.subr.bf16.mxu0 %v4598_v12  ;;  %v4646_v63 = vpack.c.bf16 %v1240_v62, %v1239_v61  ;;  %v1676_v1 = vld [vmem:[%s6459_s17] sm:$0xff]  ;;  %v1678_v3 = vld [vmem:[%s6459_s17 + $0x10] sm:$0xff]  ;;  %v1679_v5 = vld [vmem:[%s6459_s17 + $0x18] sm:$0xff] }
 0x161   : > { %v4682_v4 = vpack.c.bf16 %v1677_v2, %v1676_v1  ;;  %v4686_v6 = vpack.c.bf16 %v1679_v5, %v1678_v3  ;;  %v1222_v36 = vld [vmem:[%s6561_s9 + $0x8] sm:$0xff]  ;;  %v1223_v37 = vld [vmem:[%s6561_s9 + $0x10] sm:$0xff]  ;;  %v1680_v42 = vld [vmem:[%s6459_s17 + $0x20] sm:$0xff] }
 0x162   : > { %v1681_v43 = vld [vmem:[%s6459_s17 + $0x28] sm:$0xff]  ;;  %v1684_v48 = vld [vmem:[%s6459_s17 + $0x40] sm:$0xff]  ;;  %v1687_v52 = vld [vmem:[%s6459_s17 + $0x58] sm:$0xff] }
 0x163   : > { %4601 = vmatpush3.bf16.msra.mxu0 %v4598_v12  ;;  %v1792_v58 = vld [vmem:[%s6562_s4 + $0x18] sm:$0xff]  ;;  %v1794_v61 = vld [vmem:[%s6562_s4 + $0x28] sm:$0xff] }
 0x164   : > { %4603 = vmatprep.subr.bf16.mxu0 %v4602_v15 }
 0x167   : > { %4605 = vmatpush3.bf16.msra.mxu0 %v4602_v15 }
 0x168   : > { %4607 = vmatprep.subr.bf16.mxu0 %v4606_v18 }
 0x16b   : > { %4609 = vmatpush3.bf16.msra.mxu0 %v4606_v18 }
 0x16e   : > { %4191 = vmatmul.mubr.msk.f32.vlgmr.msra.gmra.mrb[0].mxu0 %vm961_vm0, %v5913_v19 }
 0x16f   : > { %4193 = vmatprep.mubr.msk.f32.mxu0 %vm961_vm0, %v5916_v20 }
 0x172   : > { %4194 = vmatmul.mubr.msk.f32.gmra.mrb[2].mxu0 %vm961_vm0, %v5923_v21 }
 0x173   : > { %4196 = vmatprep.mubr.msk.f32.mxu0 %vm961_vm0, %v5926_v22 }
 0x176   : > { %4197 = vmatmul.mubr.msk.f32.gmra.mrb[4].mxu0 %vm961_vm0, %v5933_v23 }
 0x177   : > { %4199 = vmatprep.mubr.msk.f32.mxu0 %vm961_vm0, %v5936_v24 }
 0x17a   : > { %4200 = vmatmul.mubr.msk.f32.gmra.mrb[6].mxu0 %vm961_vm0, %v5943_v25 }
 0x17b   : > { %4282 = vmatprep.mubr.msk.f32.mxu0 %vm1091_vm1, %v1221_v0 }
 0x241   : > { %v4192_v27 = vpop.f32.mrb[0].mxu0 }
 0x242   : > { %v1052_v28 = vpop.f32.mrb[1].mxu0 }
 0x243   : > { %v4610_v29 = vpack.c.bf16 %v4192_v27, %v1052_v28 }
 0x245   : > { %v4195_v30 = vpop.f32.mrb[2].mxu0  ;;  %4611 = vmatprep.subr.bf16.mxu1 %v4610_v29 }
 0x246   : > { %v1062_v31 = vpop.f32.mrb[3].mxu0  ;;  %4613 = vmatpush3.bf16.msra.mxu1 %v4610_v29 }
 0x247   : > { %v4614_v32 = vpack.c.bf16 %v4195_v30, %v1062_v31 }
 0x249   : > { %v4198_v33 = vpop.f32.mrb[4].mxu0  ;;  %4615 = vmatprep.subr.bf16.mxu1 %v4614_v32 }
 0x24a   : > { %v1072_v34 = vpop.f32.mrb[5].mxu0  ;;  %4617 = vmatpush3.bf16.msra.mxu1 %v4614_v32 }
 0x24b   : > { %v4618_v35 = vpack.c.bf16 %v4198_v33, %v1072_v34 }
 0x24d   : > { %v4201_v38 = vpop.f32.mrb[6].mxu0  ;;  %4619 = vmatprep.subr.bf16.mxu1 %v4618_v35 }
 0x24e   : > { %v1082_v39 = vpop.f32.mrb[7].mxu0  ;;  %4621 = vmatpush3.bf16.msra.mxu1 %v4618_v35  ;;  %v4666_v35 = vpack.c.bf16 %v5913_v19, %v5890_v8 }
 0x24f   : > { %v4622_v40 = vpack.c.bf16 %v4201_v38, %v1082_v39  ;;  %v4670_v38 = vpack.c.bf16 %v5923_v21, %v5916_v20  ;;  %v4674_v39 = vpack.c.bf16 %v5933_v23, %v5926_v22 }
 0x251   : > { %4623 = vmatprep.subr.bf16.mxu1 %v4622_v40 }
 0x252   : > { %4625 = vmatpush3.bf16.msra.mxu1 %v4622_v40  ;;  %v4678_v40 = vpack.c.bf16 %v5943_v25, %v5936_v24 }
 0x253   : > { %4627 = vmatprep.subr.bf16.mxu1 %v4626_v41 }
 0x255   : > { %4219 = vmatmul.mubr.msk.f32.vlgmr.msra.gmra.mrb[0].mxu1 %vm1091_vm1, %v942_v44  ;;  %v4690_v44 = vpack.c.bf16 %v1681_v43, %v1680_v42 }
 0x256   : > { %4629 = vmatpush3.bf16.msra.mxu1 %v4626_v41  ;;  %4221 = vmatprep.mubr.msk.f32.mxu1 %vm1091_vm1, %v943_v46  ;;  %v1578_v41 = vld [vmem:[%s6457_s15 + $0x18] sm:$0xff] }
 0x257   : > { %4631 = vmatprep.subr.bf16.mxu1 %v4630_v45  ;;  %v1683_v46 = vld [vmem:[%s6459_s17 + $0x38] sm:$0xff] }
 0x259   : > { %4222 = vmatmul.mubr.msk.f32.gmra.mrb[2].mxu1 %vm1091_vm1, %v944_v49  ;;  %v1685_v49 = vld [vmem:[%s6459_s17 + $0x48] sm:$0xff] }
 0x25a   : > { %4633 = vmatpush3.bf16.msra.mxu1 %v4630_v45  ;;  %4224 = vmatprep.mubr.msk.f32.mxu1 %vm1091_vm1, %v945_v51  ;;  %v1682_v45 = vld [vmem:[%s6459_s17 + $0x30] sm:$0xff] }
 0x25b   : > { %4635 = vmatprep.subr.bf16.mxu1 %v4634_v50  ;;  %v4694_v47 = vpack.c.bf16 %v1683_v46, %v1682_v45  ;;  %v1686_v51 = vld [vmem:[%s6459_s17 + $0x50] sm:$0xff] }
 0x25c   : > { %v4702_v53 = vpack.c.bf16 %v1687_v52, %v1686_v51 }
 0x25d   : > { %4225 = vmatmul.mubr.msk.f32.gmra.mrb[4].mxu1 %vm1091_vm1, %v946_v54  ;;  %v1789_v54 = vld [vmem:[%s6562_s4] sm:$0xff] }
 0x25e   : > { %4637 = vmatpush3.bf16.msra.mxu1 %v4634_v50  ;;  %4227 = vmatprep.mubr.msk.f32.mxu1 %vm1091_vm1, %v947_v56  ;;  %v4698_v50 = vpack.c.bf16 %v1685_v49, %v1684_v48  ;;  %v1791_v56 = vld [vmem:[%s6562_s4 + $0x10] sm:$0xff] }
 0x25f   : > { %4639 = vmatprep.subr.bf16.mxu1 %v4638_v55 }
 0x261   : > { %4228 = vmatmul.mubr.msk.f32.gmra.mrb[6].mxu1 %vm1091_vm1, %v948_v59  ;;  %v4710_v59 = vpack.c.bf16 %v1792_v58, %v1791_v56 }
 0x262   : > { %4641 = vmatpush3.bf16.msra.mxu1 %v4638_v55  ;;  %4254 = vmatprep.mubr.msk.f32.mxu1 %vm961_vm0, %v5890_v8  ;;  %v1224_v8 = vld [vmem:[%s6561_s9 + $0x18] sm:$0xff]  ;;  %v1790_v55 = vld [vmem:[%s6562_s4 + $0x8] sm:$0xff] }
 0x263   : > { %4643 = vmatprep.subr.bf16.mxu1 %v4642_v60  ;;  %v4706_v57 = vpack.c.bf16 %v1790_v55, %v1789_v54 }
 0x266   : > { %4645 = vmatpush3.bf16.msra.mxu1 %v4642_v60  ;;  %v1793_v60 = vld [vmem:[%s6562_s4 + $0x20] sm:$0xff] }
 0x267   : > { %4647 = vmatprep.subr.bf16.mxu1 %v4646_v63  ;;  %v4714_v62 = vpack.c.bf16 %v1794_v61, %v1793_v60 }
 0x26a   : > { %4649 = vmatpush3.bf16.msra.mxu1 %v4646_v63 }
 0x26b   : > { %4683 = vmatprep.subr.bf16.mxu1 %v4682_v4 }
 0x26d   : > { %4255 = vmatmul.mubr.msk.f32.vlgmr.msra.gmra.mrb[8].mxu1 %vm961_vm0, %v5913_v19  ;;  %v1225_v19 = vld [vmem:[%s6561_s9 + $0x20] sm:$0xff] }
 0x26e   : > { %4257 = vmatprep.mubr.msk.f32.mxu1 %vm961_vm0, %v5916_v20  ;;  %4685 = vmatpush3.bf16.msra.mxu1 %v4682_v4  ;;  %v1226_v20 = vld [vmem:[%s6561_s9 + $0x28] sm:$0xff] }
 0x26f   : > { %4687 = vmatprep.subr.bf16.mxu1 %v4686_v6 }
 0x271   : > { %4258 = vmatmul.mubr.msk.f32.gmra.mrb[10].mxu1 %vm961_vm0, %v5923_v21  ;;  %v1227_v21 = vld [vmem:[%s6561_s9 + $0x30] sm:$0xff] }
 0x272   : > { %4260 = vmatprep.mubr.msk.f32.mxu1 %vm961_vm0, %v5926_v22  ;;  %4689 = vmatpush3.bf16.msra.mxu1 %v4686_v6  ;;  %v1228_v22 = vld [vmem:[%s6561_s9 + $0x38] sm:$0xff]  ;;  %s5314_s9 = scalar_lea.vmem %s5313_s7, 32 }
 0x273   : > { %4691 = vmatprep.subr.bf16.mxu1 %v4690_v44 }
 0x275   : > { %4261 = vmatmul.mubr.msk.f32.gmra.mrb[12].mxu1 %vm961_vm0, %v5933_v23  ;;  %v1575_v23 = vld [vmem:[%s6457_s15] sm:$0xff] }
 0x276   : > { %4263 = vmatprep.mubr.msk.f32.mxu1 %vm961_vm0, %v5936_v24  ;;  %v1576_v24 = vld [vmem:[%s6457_s15 + $0x8] sm:$0xff]  ;;  %4693 = vmatpush3.bf16.msra.mxu1 %v4690_v44 }
 0x277   : > { %4695 = vmatprep.subr.bf16.mxu1 %v4694_v47 }
 0x279   : > { %4264 = vmatmul.mubr.msk.f32.gmra.mrb[14].mxu1 %vm961_vm0, %v5943_v25  ;;  %v1577_v25 = vld [vmem:[%s6457_s15 + $0x10] sm:$0xff] }
 0x27a   : > { %4697 = vmatpush3.bf16.msra.mxu1 %v4694_v47 }
 0x27b   : > { %4699 = vmatprep.subr.bf16.mxu1 %v4698_v50 }
 0x27e   : > { %4701 = vmatpush3.bf16.msra.mxu1 %v4698_v50 }
 0x27f   : > { %4703 = vmatprep.subr.bf16.mxu1 %v4702_v53 }
 0x282   : > { %4705 = vmatpush3.bf16.msra.mxu1 %v4702_v53 }
 0x328   : > { %v6047_v7 = vpop.f32.mrb[0].mxu1 }
 0x329   : > { %v6049_v9 = vpop.f32.mrb[1].mxu1  ;;  %v1476_v0 = vmul.f32 %v6047_v7, %v6047_v7 }
 0x32a   : > { %v1475_v3 = vmul.f32 %v6049_v9, %v6049_v9 }
 0x32c   : > { %v6051_v10 = vpop.f32.mrb[2].mxu1 }
 0x32d   : > { %v6053_v11 = vpop.f32.mrb[3].mxu1 }
 0x330   : > { %v6055_v12 = vpop.f32.mrb[4].mxu1 }
 0x331   : > { %v6057_v13 = vpop.f32.mrb[5].mxu1 }
 0x334   : > { %v6059_v14 = vpop.f32.mrb[6].mxu1 }
 0x335   : > { %v6061_v15 = vpop.f32.mrb[7].mxu1 }
 0x340   : > { %v4256_v16 = vpop.f32.mrb[8].mxu1 }
 0x341   : > { %v1307_v17 = vpop.f32.mrb[9].mxu1 }
 0x342   : > { %v4650_v18 = vpack.c.bf16 %v4256_v16, %v1307_v17  ;;  %v1478_v17 = vmul.f32 %v6051_v10, %v6051_v10 }
 0x344   : > { %v4259_v26 = vpop.f32.mrb[10].mxu1  ;;  %4651 = vmatprep.subr.bf16.mxu0 %v4650_v18 }
 0x345   : > { %v1317_v27 = vpop.f32.mrb[11].mxu1  ;;  %4653 = vmatpush3.bf16.msra.mxu0 %v4650_v18 }
 0x346   : > { %v4654_v28 = vpack.c.bf16 %v4259_v26, %v1317_v27  ;;  %v1477_v27 = vmul.f32 %v6053_v11, %v6053_v11 }
 0x348   : > { %v4262_v29 = vpop.f32.mrb[12].mxu1  ;;  %4655 = vmatprep.subr.bf16.mxu0 %v4654_v28 }
 0x349   : > { %v1327_v30 = vpop.f32.mrb[13].mxu1  ;;  %4657 = vmatpush3.bf16.msra.mxu0 %v4654_v28 }
 0x34a   : > { %v4658_v31 = vpack.c.bf16 %v4262_v29, %v1327_v30 }
 0x34c   : > { %v4265_v32 = vpop.f32.mrb[14].mxu1  ;;  %4659 = vmatprep.subr.bf16.mxu0 %v4658_v31 }
 0x34d   : > { %v1337_v33 = vpop.f32.mrb[15].mxu1  ;;  %4661 = vmatpush3.bf16.msra.mxu0 %v4658_v31  ;;  %v1480_v31 = vmul.f32 %v6055_v12, %v6055_v12 }
 0x34e   : > { %v4662_v34 = vpack.c.bf16 %v4265_v32, %v1337_v33  ;;  %v1479_v33 = vmul.f32 %v6057_v13, %v6057_v13 }
 0x350   : > { %4663 = vmatprep.subr.bf16.mxu0 %v4662_v34 }
 0x351   : > { %4665 = vmatpush3.bf16.msra.mxu0 %v4662_v34 }
 0x352   : > { %4667 = vmatprep.subr.bf16.mxu0 %v4666_v35 }
 0x354   : > { %4283 = vmatmul.mubr.msk.f32.vlgmr.msra.gmra.mrb[8].mxu0 %vm1091_vm1, %v1222_v36 }
 0x355   : > { %4669 = vmatpush3.bf16.msra.mxu0 %v4666_v35  ;;  %4285 = vmatprep.mubr.msk.f32.mxu0 %vm1091_vm1, %v1223_v37  ;;  %v1482_v37 = vmul.f32 %v6059_v14, %v6059_v14 }
 0x356   : > { %4671 = vmatprep.subr.bf16.mxu0 %v4670_v38 }
 0x358   : > { %4286 = vmatmul.mubr.msk.f32.gmra.mrb[10].mxu0 %vm1091_vm1, %v1224_v8 }
 0x359   : > { %4673 = vmatpush3.bf16.msra.mxu0 %v4670_v38  ;;  %4288 = vmatprep.mubr.msk.f32.mxu0 %vm1091_vm1, %v1225_v19 }
 0x35a   : > { %4675 = vmatprep.subr.bf16.mxu0 %v4674_v39 }
 0x35c   : > { %4289 = vmatmul.mubr.msk.f32.gmra.mrb[12].mxu0 %vm1091_vm1, %v1226_v20 }
 0x35d   : > { %4677 = vmatpush3.bf16.msra.mxu0 %v4674_v39  ;;  %4291 = vmatprep.mubr.msk.f32.mxu0 %vm1091_vm1, %v1227_v21  ;;  %v1481_v39 = vmul.f32 %v6061_v15, %v6061_v15 }
 0x35e   : > { %4679 = vmatprep.subr.bf16.mxu0 %v4678_v40 }
 0x360   : > { %4292 = vmatmul.mubr.msk.f32.gmra.mrb[14].mxu0 %vm1091_vm1, %v1228_v22 }
 0x361   : > { %4681 = vmatpush3.bf16.msra.mxu0 %v4678_v40  ;;  %4310 = vmatprep.mubr.msk.f32.mxu0 %vm1091_vm1, %v1575_v23 }
 0x362   : > { %4707 = vmatprep.subr.bf16.mxu0 %v4706_v57 }
 0x364   : > { %4311 = vmatmul.mubr.msk.f32.vlgmr.msra.gmra.mrb[16].mxu0 %vm1091_vm1, %v1576_v24 }
 0x365   : > { %4313 = vmatprep.mubr.msk.f32.mxu0 %vm1091_vm1, %v1577_v25  ;;  %4709 = vmatpush3.bf16.msra.mxu0 %v4706_v57 }
 0x366   : > { %4711 = vmatprep.subr.bf16.mxu0 %v4710_v59 }
 0x368   : > { %4314 = vmatmul.mubr.msk.f32.gmra.mrb[18].mxu0 %vm1091_vm1, %v1578_v41  ;;  %vm2318_vm1 = vcmask 130048  }
 0x369   : > { %4713 = vmatpush3.bf16.msra.mxu0 %v4710_v59 }
 0x36a   : > { %4715 = vmatprep.subr.bf16.mxu0 %v4714_v62 }
 0x36d   : > { %4717 = vmatpush3.bf16.msra.mxu0 %v4714_v62 }
 0x427   : > { %v4284_v63 = vpop.f32.mrb[8].mxu0 }
 0x428   : > { %v1484_v1 = vmul.f32 %v4284_v63, %v4284_v63  ;;  %v1436_v2 = vpop.f32.mrb[9].mxu0 }
 0x429   : > { %v1483_v4 = vmul.f32 %v1436_v2, %v1436_v2 }
 0x42a   : > { %v1492_v5 = vadd.f32 %v1484_v1, %v1476_v0 }
 0x42b   : > { %v1491_v6 = vadd.f32 %v1483_v4, %v1475_v3  ;;  %v4287_v16 = vpop.f32.mrb[10].mxu0 }
 0x42c   : > { %v1486_v18 = vmul.f32 %v4287_v16, %v4287_v16  ;;  %v1446_v26 = vpop.f32.mrb[11].mxu0  ;;  %v1500_v11 = vadd.f32 9e-12, %v1492_v5 }
 0x42d   : > { %v1485_v28 = vmul.f32 %v1446_v26, %v1446_v26  ;;  %v1499_v12 = vadd.f32 9e-12, %v1491_v6 }
 0x42e   : > { %v1494_v29 = vadd.f32 %v1486_v18, %v1478_v17 }
 0x42f   : > { %v1493_v7 = vadd.f32 %v1485_v28, %v1477_v27  ;;  %v4290_v30 = vpop.f32.mrb[12].mxu0 }
 0x430   : > { %v1488_v9 = vmul.f32 %v4290_v30, %v4290_v30  ;;  %v1456_v32 = vpop.f32.mrb[13].mxu0  ;;  %v1502_v14 = vadd.f32 9e-12, %v1494_v29 }
 0x431   : > { %v1487_v34 = vmul.f32 %v1456_v32, %v1456_v32  ;;  %v1501_v44 = vadd.f32 9e-12, %v1493_v7 }
 0x432   : > { %v1496_v35 = vadd.f32 %v1488_v9, %v1480_v31 }
 0x433   : > { %v1495_v10 = vadd.f32 %v1487_v34, %v1479_v33  ;;  %v4293_v36 = vpop.f32.mrb[14].mxu0 }
 0x434   : > { %v1504_v38 = vadd.f32 9e-12, %v1496_v35  ;;  %v1490_v8 = vmul.f32 %v4293_v36, %v4293_v36  ;;  %v1466_v19 = vpop.f32.mrb[15].mxu0 }
 0x435   : > { %v1503_v20 = vadd.f32 9e-12, %v1495_v10  ;;  %v1489_v21 = vmul.f32 %v1466_v19, %v1466_v19  ;;  %v1996_v19 = vld [vmem:[%s6564_s29 + $0x8] sm:$0xff] }
 0x436   : > { %v1508_v40 = vmul.f32 %v1504_v38, %v1500_v11  ;;  %v1548_v22 = vadd.f32 %v1504_v38, %v1500_v11  ;;  %v1498_v13 = vadd.f32 %v1490_v8, %v1482_v37  ;;  %v1995_v8 = vld [vmem:[%s6563_s3] sm:$0xff]  ;;  %s927_s3 = scalar_lea.vmem [#allocation19], %s926_s2 }
 0x437   : > { %v1507_v23 = vmul.f32 %v1503_v20, %v1499_v12  ;;  %v1547_v24 = vadd.f32 %v1503_v20, %v1499_v12  ;;  %v1497_v25 = vadd.f32 %v1489_v21, %v1481_v39  ;;  %v4312_v41 = vpop.f32.mrb[16].mxu0  ;;  %v4726_v39 = vpack.c.bf16 %v1996_v19, %v1995_v8  ;;  %v1997_v12 = vld [vmem:[%s6564_s29 + $0x10] sm:$0xff]  ;;  %v1998_v20 = vld [vmem:[%s6564_s29 + $0x18] sm:$0xff] }
 0x438   : > { %5000 = vrsqrt.f32 %v1508_v40  ;;  %v1657_v42 = vpop.f32.mrb[17].mxu0  ;;  %v1506_v43 = vadd.f32 9e-12, %v1498_v13  ;;  %v1552_v48 = vadd.f32 0.0234, %v1548_v22  ;;  %vm1520_vm2 = vcmp.eq.f32.partialorder %v1508_v40, inf }
 0x439   : > { %5002 = vrsqrt.f32 %v1507_v23  ;;  %4340 = vmatprep.mubr.msk.f32.mxu1 %vm961_vm0, %v1657_v42  ;;  %v1505_v45 = vadd.f32 9e-12, %v1497_v25  ;;  %v1551_v52 = vadd.f32 0.0234, %v1547_v24  ;;  %vm1522_vm3 = vcmp.eq.f32.partialorder %v1508_v40, 0.0  ;;  %4727 = vmatprep.subr.bf16.mxu0 %v4726_v39  ;;  %v2000_v24 = vld [vmem:[%s6564_s29 + $0x28] sm:$0xff] }
 0x43a   : > { %4341 = vmatmul.mubr.msk.f32.vlgmr.msra.gmra.mrb[16].mxu1 %vm961_vm0, %v4312_v41  ;;  %v1510_v15 = vmul.f32 %v1506_v43, %v1502_v14  ;;  %v1550_v46 = vadd.f32 %v1506_v43, %v1502_v14  ;;  %v1523_v58 = vand.u32 2147483648, %v1508_v40  ;;  %vm1513_vm4 = vcmp.eq.f32.partialorder %v1507_v23, inf  ;;  %v1785_v43 = vld [vmem:[#allocation2] sm:$0xff] }
 0x43b   : > { %v4315_v47 = vpop.f32.mrb[18].mxu0  ;;  %v1509_v49 = vmul.f32 %v1505_v45, %v1501_v44  ;;  %v1549_v50 = vadd.f32 %v1505_v45, %v1501_v44  ;;  %v1516_v61 = vand.u32 2147483648, %v1507_v23  ;;  %vm1515_vm5 = vcmp.eq.f32.partialorder %v1507_v23, 0.0 }
 0x43c   : > { %v1667_v51 = vpop.f32.mrb[19].mxu0  ;;  %5004 = vrsqrt.f32 %v1510_v15  ;;  %v1554_v53 = vadd.f32 0.0234, %v1550_v46  ;;  %vm1534_vm6 = vcmp.eq.f32.partialorder %v1510_v15, inf  ;;  %vm1536_vm7 = vcmp.eq.f32.partialorder %v1510_v15, 0.0 }
 0x43d   : > { %4343 = vmatprep.mubr.msk.f32.mxu1 %vm961_vm0, %v1667_v51  ;;  %5006 = vrsqrt.f32 %v1509_v49  ;;  %v1553_v55 = vadd.f32 0.0234, %v1549_v50  ;;  %v1537_v17 = vand.u32 2147483648, %v1510_v15  ;;  %vm1527_vm8 = vcmp.eq.f32.partialorder %v1509_v49, inf  ;;  %v1787_v50 = vld [vmem:[#allocation2 + $0x10] sm:$0xff] }
 0x43e   : > { %4344 = vmatmul.mubr.msk.f32.gmra.mrb[18].mxu1 %vm961_vm0, %v4315_v47  ;;  %5008 = vrcp.f32 %v1552_v48  ;;  %v1530_v27 = vand.u32 2147483648, %v1509_v49  ;;  %vm1529_vm9 = vcmp.eq.f32.partialorder %v1509_v49, 0.0  ;;  %v4730_v22 = vpack.c.bf16 %v1998_v20, %v1997_v12 }
 0x43f   : > { %5010 = vrcp.f32 %v1551_v52  ;;  %4372 = vmatprep.mubr.msk.f32.mxu1 %vm1893_vm11, %v1785_v43 }
 0x440   : > { %5012 = vrcp.f32 %v1554_v53  ;;  %v1788_v53 = vld [vmem:[#allocation2 + $0x18] sm:$0xff] }
 0x441   : > { %5014 = vrcp.f32 %v1553_v55  ;;  %v1991_v55 = vld [vmem:[#allocation7] sm:$0xff] }
 0x442   : > { %v5001_v54 = vpop.eup %5000 }
 0x443   : > { %v5003_v56 = vpop.eup %5002  ;;  %v1519_v57 = vmul.f32 %v5001_v54, %v1508_v40 }
 0x444   : > { %v1512_v59 = vmul.f32 %v5003_v56, %v1507_v23 }
 0x445   : > { %v1521_v60 = vsel %vm1520_vm2, %v1508_v40, %v1519_v57  ;;  %vm5409_vm2 = vmmov 0  }
 0x446   : > { %v1524_v62 = vsel %vm1522_vm3, %v1523_v58, %v1521_v60  ;;  %v1514_v63 = vsel %vm1513_vm4, %v1507_v23, %v1512_v59  ;;  %v5005_v0 = vpop.eup %5004  ;;  %v1999_v23 = vld [vmem:[%s6564_s29 + $0x20] sm:$0xff]  ;;  %v1992_v59 = vld [vmem:[#allocation7 + $0x8] sm:$0xff] }
 0x447   : > { %v1540_v1 = vmul.f32 2.0, %v1524_v62  ;;  %v1517_v2 = vsel %vm1515_vm5, %v1516_v61, %v1514_v63  ;;  %v5007_v3 = vpop.eup %5006  ;;  %v1533_v5 = vmul.f32 %v5005_v0, %v1510_v15  ;;  %v4734_v42 = vpack.c.bf16 %v2000_v24, %v1999_v23  ;;  %v1993_v60 = vld [vmem:[#allocation7 + $0x10] sm:$0xff]  ;;  %v1994_v61 = vld [vmem:[#allocation7 + $0x18] sm:$0xff] }
 0x448   : > { %v1539_v4 = vmul.f32 2.0, %v1517_v2  ;;  %v1526_v16 = vmul.f32 %v5007_v3, %v1509_v49  ;;  %v5009_v18 = vpop.eup %5008  ;;  %v2227_v62 = vld [vmem:[%s6455_s13] sm:$0xff]  ;;  %v2228_v63 = vld [vmem:[%s6455_s13 + $0x8] sm:$0xff]  ;;  %v2230_v2 = vld [vmem:[%s6455_s13 + $0x18] sm:$0xff]  ;;  %vm3213_vm5 = vcmask 64512  }
 0x449   : > { %v1544_v6 = vadd.f32 0.0234, %v1540_v1  ;;  %v1535_v28 = vsel %vm1534_vm6, %v1510_v15, %v1533_v5  ;;  %v5011_v29 = vpop.eup %5010  ;;  %v4746_v0 = vpack.c.bf16 %v2228_v63, %v2227_v62  ;;  %v2229_v1 = vld [vmem:[%s6455_s13 + $0x10] sm:$0xff]  ;;  %v2232_v5 = vld [vmem:[%s6455_s13 + $0x28] sm:$0xff]  ;;  %v2416_v62 = vld [vmem:[#allocation14] sm:$0xff] }
 0x44a   : > { %v1543_v26 = vadd.f32 0.0234, %v1539_v4  ;;  %v1528_v30 = vsel %vm1527_vm8, %v1509_v49, %v1526_v16  ;;  %v1538_v31 = vsel %vm1536_vm7, %v1537_v17, %v1535_v28  ;;  %v5013_v10 = vpop.eup %5012  ;;  %v1786_v49 = vld [vmem:[#allocation2 + $0x8] sm:$0xff]  ;;  %v4750_v3 = vpack.c.bf16 %v2230_v2, %v2229_v1  ;;  %v2231_v4 = vld [vmem:[%s6455_s13 + $0x20] sm:$0xff] }
 0x44b   : > { %v6177_v7 = vmul.f32 %v5009_v18, %v1544_v6  ;;  %v1531_v32 = vsel %vm1529_vm9, %v1530_v27, %v1528_v30  ;;  %v1542_v33 = vmul.f32 2.0, %v1538_v31  ;;  %v5015_v37 = vpop.eup %5014  ;;  %v4754_v6 = vpack.c.bf16 %v2232_v5, %v2231_v4  ;;  %v2417_v63 = vld [vmem:[#allocation14 + $0x8] sm:$0xff]  ;;  %v2316_v5 = vld [vmem:[%s6461_s19 + $0x10] sm:$0xff] }
 0x44c   : > { %v6179_v9 = vmul.f32 %v5011_v29, %v1543_v26  ;;  %v1541_v34 = vmul.f32 2.0, %v1531_v32  ;;  %v2315_v4 = vld [vmem:[%s6461_s19 + $0x8] sm:$0xff] }
 0x44d   : > { %v1546_v35 = vadd.f32 0.0234, %v1542_v33 }
 0x44e   : > { %v1545_v36 = vadd.f32 0.0234, %v1541_v34 }
 0x44f   : > { %v6181_v11 = vmul.f32 %v5013_v10, %v1546_v35 }
 0x450   : > { %v6183_v38 = vmul.f32 %v5015_v37, %v1545_v36 }
 0x50d   : > { %v4342_v21 = vpop.f32.mrb[16].mxu1 }
 0x50e   : > { %v1766_v40 = vpop.f32.mrb[17].mxu1 }
 0x50f   : > { %v6197_v13 = vpack.c.bf16 %v4342_v21, %v1766_v40  ;;  %4358 = vmatprep.mubr.msk.f32.mxu0 %vm1795_vm10, %v1766_v40 }
 0x510   : > { %4359 = vmatmul.mubr.msk.f32.vlgmr.msra.gmra.mrb[20].mxu0 %vm1795_vm10, %v4342_v21 }
 0x511   : > { %4729 = vmatpush3.bf16.msra.mxu0 %v4726_v39  ;;  %v4345_v25 = vpop.f32.mrb[18].mxu1 }
 0x512   : > { %v1776_v41 = vpop.f32.mrb[19].mxu1  ;;  %4731 = vmatprep.subr.bf16.mxu0 %v4730_v22 }
 0x513   : > { %v6207_v14 = vpack.c.bf16 %v4345_v25, %v1776_v41  ;;  %4361 = vmatprep.mubr.msk.f32.mxu0 %vm1795_vm10, %v1776_v41 }
 0x514   : > { %4362 = vmatmul.mubr.msk.f32.gmra.mrb[22].mxu0 %vm1795_vm10, %v4345_v25 }
 0x515   : > { %4733 = vmatpush3.bf16.msra.mxu0 %v4730_v22  ;;  %4390 = vmatprep.mubr.msk.f32.mxu0 %vm1795_vm10, %v1766_v40 }
 0x516   : > { %4735 = vmatprep.subr.bf16.mxu0 %v4734_v42 }
 0x519   : > { %4737 = vmatpush3.bf16.msra.mxu0 %v4734_v42 }
 0x51a   : > { %4747 = vmatprep.subr.bf16.mxu0 %v4746_v0 }
 0x51c   : > { %4391 = vmatmul.mubr.msk.f32.vlgmr.msra.gmra.mrb[24].mxu0 %vm1795_vm10, %v4342_v21 }
 0x51d   : > { %4393 = vmatprep.mubr.msk.f32.mxu0 %vm1795_vm10, %v1776_v41  ;;  %4749 = vmatpush3.bf16.msra.mxu0 %v4746_v0  ;;  %v4762_v0 = vpack.c.bf16 %v2417_v63, %v2416_v62  ;;  %v2951_v63 = vld [vmem:[#allocation8 + $0x8] sm:$0xff] }
 0x51e   : > { %4751 = vmatprep.subr.bf16.mxu0 %v4750_v3 }
 0x520   : > { %4394 = vmatmul.mubr.msk.f32.gmra.mrb[26].mxu0 %vm1795_vm10, %v4345_v25 }
 0x521   : > { %4753 = vmatpush3.bf16.msra.mxu0 %v4750_v3 }
 0x522   : > { %4755 = vmatprep.subr.bf16.mxu0 %v4754_v6 }
 0x525   : > { %4757 = vmatpush3.bf16.msra.mxu0 %v4754_v6  ;;  %v2317_v6 = vld [vmem:[%s6461_s19 + $0x18] sm:$0xff] }
 0x526   : > { %4763 = vmatprep.subr.bf16.mxu0 %v4762_v0 }
 0x5e3   : > { %v4360_v44 = vpop.f32.mrb[20].mxu0 }
 0x5e4   : > { %v1874_v45 = vpop.f32.mrb[21].mxu0 }
 0x5e5   : > { %v4718_v15 = vpack.c.bf16 %v4360_v44, %v1874_v45 }
 0x5e7   : > { %v4363_v46 = vpop.f32.mrb[22].mxu0  ;;  %4719 = vmatprep.subr.bf16.mxu1 %v4718_v15 }
 0x5e8   : > { %v1884_v47 = vpop.f32.mrb[23].mxu0  ;;  %4721 = vmatpush3.bf16.msra.mxu1 %v4718_v15 }
 0x5e9   : > { %v4722_v48 = vpack.c.bf16 %v4363_v46, %v1884_v47 }
 0x5eb   : > { %4723 = vmatprep.subr.bf16.mxu1 %v4722_v48 }
 0x5ec   : > { %4725 = vmatpush3.bf16.msra.mxu1 %v4722_v48 }
 0x5ef   : > { %v4392_v51 = vpop.f32.mrb[24].mxu0  ;;  %4373 = vmatmul.mubr.msk.f32.vlgmr.msra.gmra.mrb[20].mxu1 %vm1893_vm11, %v1786_v49 }
 0x5f0   : > { %v2067_v52 = vpop.f32.mrb[25].mxu0  ;;  %4375 = vmatprep.mubr.msk.f32.mxu1 %vm1893_vm11, %v1787_v50 }
 0x5f1   : > { %v4738_v54 = vpack.c.bf16 %v4392_v51, %v2067_v52 }
 0x5f3   : > { %v4395_v56 = vpop.f32.mrb[26].mxu0  ;;  %4739 = vmatprep.subr.bf16.mxu1 %v4738_v54  ;;  %4376 = vmatmul.mubr.msk.f32.gmra.mrb[22].mxu1 %vm1893_vm11, %v1788_v53 }
 0x5f4   : > { %v2077_v57 = vpop.f32.mrb[27].mxu0  ;;  %4741 = vmatpush3.bf16.msra.mxu1 %v4738_v54  ;;  %4404 = vmatprep.mubr.msk.f32.mxu1 %vm1893_vm11, %v1991_v55 }
 0x5f5   : > { %v4742_v58 = vpack.c.bf16 %v4395_v56, %v2077_v57 }
 0x5f7   : > { %4743 = vmatprep.subr.bf16.mxu1 %v4742_v58 }
 0x5f8   : > { %4745 = vmatpush3.bf16.msra.mxu1 %v4742_v58 }
 0x5fb   : > { %4405 = vmatmul.mubr.msk.f32.vlgmr.msra.gmra.mrb[24].mxu1 %vm1893_vm11, %v1992_v59 }
 0x5fc   : > { %4407 = vmatprep.mubr.msk.f32.mxu1 %vm1893_vm11, %v1993_v60 }
 0x5ff   : > { %4408 = vmatmul.mubr.msk.f32.gmra.mrb[26].mxu1 %vm1893_vm11, %v1994_v61  ;;  %v2314_v61 = vld [vmem:[%s6461_s19] sm:$0xff] }
 0x600   : > { %4429 = vmatprep.mubr.msk.f32.mxu1 %vm2318_vm1, %v2314_v61 }
 0x6c2   : > { %v4374_v16 = vpop.f32.mrb[20].mxu1 }
 0x6c3   : > { %v1972_v17 = vpop.f32.mrb[21].mxu1  ;;  %v2184_v28 = vmul.f32 %v4374_v16, %v4374_v16  ;;  %v1563_v16 = vld [vmem:[%s6454_s12] sm:$0xff] }
 0x6c4   : > { %v2183_v31 = vmul.f32 %v1972_v17, %v1972_v17  ;;  %v1564_v17 = vld [vmem:[%s6454_s12 + $0x8] sm:$0xff] }
 0x6c6   : > { %v4377_v18 = vpop.f32.mrb[22].mxu1 }
 0x6c7   : > { %v1982_v26 = vpop.f32.mrb[23].mxu1  ;;  %v2186_v10 = vmul.f32 %v4377_v18, %v4377_v18  ;;  %v4766_v18 = vpack.c.bf16 %v1564_v17, %v1563_v16 }
 0x6c8   : > { %v2185_v8 = vmul.f32 %v1982_v26, %v1982_v26  ;;  %v2695_v26 = vld [vmem:[%s6565_s28] sm:$0xff]  ;;  %s6567_s28 = sld [smem:[#allocation47_spill]] }
 0x6ce   : > { %v4406_v27 = vpop.f32.mrb[24].mxu1  ;;  %s6568_s11 = smov %s6567_s28 }
 0x6cf   : > { %v2188_v29 = vmul.f32 %v4406_v27, %v4406_v27  ;;  %v2164_v30 = vpop.f32.mrb[25].mxu1  ;;  %v2696_v27 = vld [vmem:[%s6566_s1 + $0x8] sm:$0xff] }
 0x6d0   : > { %v2187_v32 = vmul.f32 %v2164_v30, %v2164_v30  ;;  %v2698_v30 = vld [vmem:[%s6566_s1 + $0x18] sm:$0xff] }
 0x6d1   : > { %v2192_v33 = vadd.f32 %v2188_v29, %v2184_v28  ;;  %v2697_v28 = vld [vmem:[%s6566_s1 + $0x10] sm:$0xff]  ;;  %v4798_v29 = vpack.c.bf16 %v2696_v27, %v2695_v26 }
 0x6d2   : > { %v2191_v34 = vadd.f32 %v2187_v32, %v2183_v31  ;;  %v4409_v35 = vpop.f32.mrb[26].mxu1  ;;  %v4802_v31 = vpack.c.bf16 %v2698_v30, %v2697_v28  ;;  %v2699_v32 = vld [vmem:[%s6566_s1 + $0x20] sm:$0xff] }
 0x6d3   : > { %v2190_v36 = vmul.f32 %v4409_v35, %v4409_v35  ;;  %v2174_v37 = vpop.f32.mrb[27].mxu1  ;;  %v2196_v20 = vadd.f32 9e-12, %v2192_v33  ;;  %v2700_v33 = vld [vmem:[%s6566_s1 + $0x28] sm:$0xff]  ;;  %v1565_v35 = vld [vmem:[%s6454_s12 + $0x10] sm:$0xff]  ;;  %s6573_s1 = sld [smem:[#allocation52_spill]] }
 0x6d4   : > { %v2189_v19 = vmul.f32 %v2174_v37, %v2174_v37  ;;  %v2195_v40 = vadd.f32 9e-12, %v2191_v34  ;;  %v4806_v34 = vpack.c.bf16 %v2700_v33, %v2699_v32 }
 0x6d5   : > { %v2194_v39 = vadd.f32 %v2190_v36, %v2186_v10  ;;  %v1566_v10 = vld [vmem:[%s6454_s12 + $0x18] sm:$0xff] }
 0x6d6   : > { %v2193_v12 = vadd.f32 %v2189_v19, %v2185_v8  ;;  %v4770_v8 = vpack.c.bf16 %v1566_v10, %v1565_v35  ;;  %v1567_v19 = vld [vmem:[%s6454_s12 + $0x20] sm:$0xff] }
 0x6d7   : > { %v2198_v21 = vadd.f32 9e-12, %v2194_v39  ;;  %v1568_v39 = vld [vmem:[%s6454_s12 + $0x28] sm:$0xff] }
 0x6d8   : > { %v2197_v22 = vadd.f32 9e-12, %v2193_v12 }
 0x6d9   : > { %v2200_v23 = vmul.f32 %v2198_v21, %v2196_v20  ;;  %v2220_v24 = vadd.f32 %v2198_v21, %v2196_v20  ;;  %v4774_v21 = vpack.c.bf16 %v1568_v39, %v1567_v19  ;;  %s6402_s4 = scalar_lea.hbm %s6573_s1, %s3928_s21 }
 0x6da   : > { %v2199_v25 = vmul.f32 %v2197_v22, %v2195_v40  ;;  %v2219_v41 = vadd.f32 %v2197_v22, %v2195_v40  ;;  %v1569_v40 = vld [vmem:[%s6454_s12 + $0x30] sm:$0xff]  ;;  %v1570_v22 = vld [vmem:[%s6454_s12 + $0x38] sm:$0xff] }
 0x6db   : > { %5016 = vrsqrt.f32 %v2200_v23  ;;  %v2222_v42 = vadd.f32 0.0234, %v2220_v24  ;;  %vm2210_vm12 = vcmp.eq.f32.partialorder %v2200_v23, inf  ;;  %v2213_v46 = vand.u32 2147483648, %v2200_v23  ;;  %v1571_v24 = vld [vmem:[%s6454_s12 + $0x40] sm:$0xff] }
 0x6dc   : > { %5018 = vrsqrt.f32 %v2199_v25  ;;  %v2221_v43 = vadd.f32 0.0234, %v2219_v41  ;;  %vm2212_vm13 = vcmp.eq.f32.partialorder %v2200_v23, 0.0  ;;  %vm2203_vm14 = vcmp.eq.f32.partialorder %v2199_v25, inf }
 0x6dd   : > { %5020 = vrcp.f32 %v2222_v42  ;;  %v2206_v49 = vand.u32 2147483648, %v2199_v25  ;;  %vm2205_vm15 = vcmp.eq.f32.partialorder %v2199_v25, 0.0  ;;  %v1573_v42 = vld [vmem:[%s6454_s12 + $0x50] sm:$0xff] }
 0x6de   : > { %5022 = vrcp.f32 %v2221_v43 }
 0x6e5   : > { %v5017_v44 = vpop.eup %5016 }
 0x6e6   : > { %v5019_v45 = vpop.eup %5018  ;;  %v2209_v15 = vmul.f32 %v5017_v44, %v2200_v23  ;;  %v2612_v44 = vld [vmem:[#allocation13] sm:$0xff] }
 0x6e7   : > { %v2202_v47 = vmul.f32 %v5019_v45, %v2199_v25  ;;  %v5021_v56 = vpop.eup %5020  ;;  %v2613_v45 = vld [vmem:[#allocation13 + $0x8] sm:$0xff] }
 0x6e8   : > { %v2211_v48 = vsel %vm2210_vm12, %v2200_v23, %v2209_v15  ;;  %v5023_v58 = vpop.eup %5022  ;;  %v4778_v23 = vpack.c.bf16 %v1570_v22, %v1569_v40  ;;  %v2784_v15 = vld [vmem:[#allocation11] sm:$0xff]  ;;  %v3210_v22 = vld [vmem:[%s6569_s18 + $0x8] sm:$0xff] }
 0x6e9   : > { %v2214_v50 = vsel %vm2212_vm13, %v2213_v46, %v2211_v48  ;;  %v2204_v51 = vsel %vm2203_vm14, %v2199_v25, %v2202_v47  ;;  %v1572_v25 = vld [vmem:[%s6454_s12 + $0x48] sm:$0xff]  ;;  %v2782_v48 = vld [vmem:[#allocation5] sm:$0xff] }
 0x6ea   : > { %v2216_v52 = vmul.f32 2.0, %v2214_v50  ;;  %v2207_v53 = vsel %vm2205_vm15, %v2206_v49, %v2204_v51  ;;  %v4782_v41 = vpack.c.bf16 %v1572_v25, %v1571_v24  ;;  %v2952_v49 = vld [vmem:[#allocation10] sm:$0xff]  ;;  %v2953_v50 = vld [vmem:[#allocation10 + $0x8] sm:$0xff]  ;;  %v3211_v25 = vld [vmem:[%s6569_s18 + $0x10] sm:$0xff] }
 0x6eb   : > { %v2215_v54 = vmul.f32 2.0, %v2207_v53 }
 0x6ec   : > { %v2218_v55 = vadd.f32 0.0234, %v2216_v52 }
 0x6ed   : > { %v2217_v57 = vadd.f32 0.0234, %v2215_v54  ;;  %v4818_v54 = vpack.c.bf16 %v2953_v50, %v2952_v49  ;;  %v3519_v49 = vld [vmem:[#allocation17 + $0x8] sm:$0xff] }
 0x6ee   : > { %v2226_v59 = vmul.f32 %v5021_v56, %v2218_v55  ;;  %v2783_v55 = vld [vmem:[#allocation5 + $0x8] sm:$0xff]  ;;  %v2954_v56 = vld [vmem:[#allocation10 + $0x10] sm:$0xff] }
 0x6ef   : > { %v2225_v60 = vmul.f32 %v5023_v58, %v2217_v57  ;;  %v2950_v57 = vld [vmem:[#allocation8] sm:$0xff] }
 0x6f1   : > { %4422 = vmatprep.mubr.msk.f32.mxu0 %vm1795_vm10, %v2225_v60 }
 0x6f2   : > { %4423 = vmatmul.mubr.msk.f32.vlgmr.msra.gmra.mrb[28].mxu0 %vm1795_vm10, %v2226_v59 }
 0x6f3   : > { %4765 = vmatpush3.bf16.msra.mxu0 %v4762_v0  ;;  %v3133_v0 = vld [vmem:[%s6567_s28] sm:$0xff]  ;;  %s3650_s28 = sshll.u32 %s927_s3, 4  ;;  %s6397_s28 = int_to_ptr.vmem [resolvable:$true] %s3650_s28 }
 0x6f4   : > { %4767 = vmatprep.subr.bf16.mxu0 %v4766_v18  ;;  %s5308_s6 = scalar_lea.vmem %s6397_s28, 16  ;;  %p5315_p3 = scmp.lt.s32.totalorder %s6397_s28, %s5313_s7 }
 0x6f5   : > { %p5309_p5 = scmp.ne.s32.totalorder %s6397_s28, %s5308_s6  ;;  %p5316_p4 = scmp.lt.s32.totalorder %s5314_s9, %s5308_s6 }
 0x6f7   : > { %p5310_p10 = pnand %p5309_p5, %p6574_p0  ;;  %p5317_p12 = por %p5316_p4, %p5315_p3 }
 0x6f9   : > { %p5311_p2 = pneg %p5310_p10 }
 0x6fb   : > { %p5318_p7 = pnand %p5317_p12, %p5311_p2 }
 0x7c5   : > { %v4424_v1 = vpop.f32.mrb[28].mxu0 }
 0x7c6   : > { %v2305_v2 = vpop.f32.mrb[29].mxu0 }
 0x7c7   : > { %v4758_v3 = vpack.c.bf16 %v4424_v1, %v2305_v2  ;;  %v3134_v1 = vld [vmem:[%s6568_s11 + $0x8] sm:$0xff]  ;;  %v5408_v2 = vmov 0.0|0.0  }
 0x7c9   : > { %4759 = vmatprep.subr.bf16.mxu1 %v4758_v3 }
 0x7ca   : > { %4761 = vmatpush3.bf16.msra.mxu1 %v4758_v3  ;;  %v4827_v3 = vpack.c.bf16 %v3134_v1, %v3133_v0 }
 0x7cb   : > { %4799 = vmatprep.subr.bf16.mxu1 %v4798_v29 }
 0x7cd   : > { %4430 = vmatmul.mubr.msk.f32.vlgmr.msra.gmra.mrb[28].mxu1 %vm2318_vm1, %v2315_v4  ;;  %v5410_v4 = vmov 0.0  }
 0x7ce   : > { %4432 = vmatprep.mubr.msk.f32.mxu1 %vm2318_vm1, %v2316_v5  ;;  %4801 = vmatpush3.bf16.msra.mxu1 %v4798_v29  ;;  %v3135_v5 = vld [vmem:[%s6568_s11 + $0x10] sm:$0xff] }
 0x7cf   : > { %4803 = vmatprep.subr.bf16.mxu1 %v4802_v31 }
 0x7d1   : > { %4433 = vmatmul.mubr.msk.f32.gmra.mrb[30].mxu1 %vm2318_vm1, %v2317_v6 }
 0x7d2   : > { %4805 = vmatpush3.bf16.msra.mxu1 %v4802_v31 }
 0x7d3   : > { %4807 = vmatprep.subr.bf16.mxu1 %v4806_v34 }
 0x7d6   : > { %4809 = vmatpush3.bf16.msra.mxu1 %v4806_v34 }
 0x8a0   : > { %v4431_v36 = vpop.f32.mrb[28].mxu1 }
 0x8a1   : > { %v2397_v37 = vpop.f32.mrb[29].mxu1 }
 0x8a2   : > { %4439 = vmatprep.mubr.msk.f32.mxu0 %vm2318_vm1, %v2397_v37 }
 0x8a3   : > { %4440 = vmatmul.mubr.msk.f32.vlgmr.msra.gmra.mrb[30].mxu0 %vm2318_vm1, %v4431_v36 }
 0x8a4   : > { %4769 = vmatpush3.bf16.msra.mxu0 %v4766_v18  ;;  %v4434_v12 = vpop.f32.mrb[30].mxu1 }
 0x8a5   : > { %v2407_v20 = vpop.f32.mrb[31].mxu1  ;;  %4771 = vmatprep.subr.bf16.mxu0 %v4770_v8 }
 0x8a6   : > { %4442 = vmatprep.mubr.msk.f32.mxu0 %vm2318_vm1, %v2407_v20 }
 0x8a7   : > { %4443 = vmatmul.mubr.msk.f32.gmra.mrb[32].mxu0 %vm2318_vm1, %v4434_v12 }
 0x8a8   : > { %4773 = vmatpush3.bf16.msra.mxu0 %v4770_v8  ;;  %4469 = vmatprep.mubr.msk.f32.mxu0 %vm961_vm0, %v6179_v9  ;;  %v1574_v9 = vld [vmem:[%s6454_s12 + $0x58] sm:$0xff] }
 0x8a9   : > { %4775 = vmatprep.subr.bf16.mxu0 %v4774_v21  ;;  %v4786_v43 = vpack.c.bf16 %v1574_v9, %v1573_v42 }
 0x8ac   : > { %4777 = vmatpush3.bf16.msra.mxu0 %v4774_v21  ;;  %v3209_v21 = vld [vmem:[%s6569_s18] sm:$0xff] }
 0x8ad   : > { %4779 = vmatprep.subr.bf16.mxu0 %v4778_v23 }
 0x8b0   : > { %4781 = vmatpush3.bf16.msra.mxu0 %v4778_v23  ;;  %v3311_v23 = vld [vmem:[#allocation16] sm:$0xff] }
 0x8b1   : > { %4783 = vmatprep.subr.bf16.mxu0 %v4782_v41 }
 0x8b4   : > { %4785 = vmatpush3.bf16.msra.mxu0 %v4782_v41  ;;  %v3212_v41 = vld [vmem:[%s6569_s18 + $0x18] sm:$0xff] }
 0x8b5   : > { %4787 = vmatprep.subr.bf16.mxu0 %v4786_v43 }
 0x8b8   : > { %4789 = vmatpush3.bf16.msra.mxu0 %v4786_v43 }
 0x8b9   : > { %4791 = vmatprep.subr.bf16.mxu0 %v6197_v13 }
 0x8bb   : > { %4470 = vmatmul.mubr.msk.f32.vlgmr.msra.gmra.mrb[30].mxu0 %vm961_vm0, %v6177_v7  ;;  %v2785_v7 = vld [vmem:[#allocation11 + $0x8] sm:$0xff] }
 0x8bc   : > { %4472 = vmatprep.mubr.msk.f32.mxu0 %vm961_vm0, %v6183_v38  ;;  %4793 = vmatpush3.bf16.msra.mxu0 %v6197_v13  ;;  %v4810_v46 = vpack.c.bf16 %v2785_v7, %v2784_v15  ;;  %v2786_v13 = vld [vmem:[#allocation11 + $0x10] sm:$0xff] }
 0x8bd   : > { %4795 = vmatprep.subr.bf16.mxu0 %v6207_v14 }
 0x8be   : > { %4811 = vmatprep.subr.bf16.mxu1 %v4810_v46 }
 0x8bf   : > { %4473 = vmatmul.mubr.msk.f32.gmra.mrb[32].mxu0 %vm961_vm0, %v6181_v11  ;;  %vm2787_vm0 = vcmask 195584  }
 0x8c0   : > { %4797 = vmatpush3.bf16.msra.mxu0 %v6207_v14  ;;  %4483 = vmatprep.mubr.msk.f32.mxu0 %vm1893_vm11, %v2612_v44 }
 0x8c3   : > { %4484 = vmatmul.mubr.msk.f32.vlgmr.msra.gmra.mrb[34].mxu0 %vm1893_vm11, %v2613_v45  ;;  %v3417_v45 = vld [vmem:[%s6570_s0] sm:$0xff] }
 0x8c4   : > { %4544 = vmatprep.mubr.msk.f32.mxu0 %vm3213_vm5, %v3209_v21 }
 0x996   : > { %v4485_v38 = vpop.f32.mrb[34].mxu0 }
 0x997   : > { %v2686_v47 = vpop.f32.mrb[35].mxu0 }
 0x998   : > { %4498 = vmatprep.mubr.msk.f32.mxu1 %vm1795_vm10, %v2686_v47 }
 0x999   : > { %4499 = vmatmul.mubr.msk.f32.vlgmr.msra.gmra.mrb[32].mxu1 %vm1795_vm10, %v4485_v38 }
 0x99a   : > { %4813 = vmatpush3.bf16.msra.mxu1 %v4810_v46 }
 0x99b   : > { %4505 = vmatprep.subr.mxu1 %v2786_v13 }
 0x99e   : > { %4506 = vmatpush3.msra.mxu1 %v2786_v13 }
 0xa6c   : > { %v4500_v11 = vpop.f32.mrb[32].mxu1 }
 0xa6d   : > { %v2773_v14 = vpop.f32.mrb[33].mxu1 }
 0xa6e   : > { %4507 = vmatprep.mubr.msk.f32.mxu1 %vm2787_vm0, %v2773_v14 }
 0xa6f   : > { %4508 = vmatmul.mubr.msk.f32.vlgmr.msra.gmra.mrb[34].mxu1 %vm2787_vm0, %v4500_v11 }
 0xa70   : > { %4514 = vmatprep.mubr.msk.f32.mxu1 %vm2318_vm1, %v2782_v48  ;;  %v3518_v48 = vld [vmem:[#allocation17] sm:$0xff] }
 0xb42   : > { %v4509_v51 = vpop.f32.mrb[34].mxu1 }
 0xb43   : > { %v2860_v52 = vpop.f32.mrb[35].mxu1 }
 0xb44   : > { %v4814_v53 = vpack.c.bf16 %v4509_v51, %v2860_v52  ;;  %v4837_v52 = vpack.c.bf16 %v3519_v49, %v3518_v48 }
 0xb46   : > { %4815 = vmatprep.subr.bf16.mxu1 %v4814_v53 }
 0xb47   : > { %4817 = vmatpush3.bf16.msra.mxu1 %v4814_v53  ;;  %v3520_v53 = vld [vmem:[#allocation17 + $0x10] sm:$0xff] }
 0xb48   : > { %4819 = vmatprep.subr.bf16.mxu1 %v4818_v54 }
 0xb4a   : > { %4515 = vmatmul.mubr.msk.f32.vlgmr.msra.gmra.mrb[36].mxu1 %vm2318_vm1, %v2783_v55  ;;  %v3418_v55 = vld [vmem:[%s6570_s0 + $0x8] sm:$0xff] }
 0xb4b   : > { %4821 = vmatpush3.bf16.msra.mxu1 %v4818_v54  ;;  %4523 = vmatprep.mubr.msk.f32.mxu1 %vm2787_vm0, %v2773_v14  ;;  %v3521_v54 = vld [vmem:[#allocation17 + $0x18] sm:$0xff] }
 0xb4c   : > { %4521 = vmatprep.subr.mxu1 %v2954_v56 }
 0xb4f   : > { %4522 = vmatpush3.msra.mxu1 %v2954_v56  ;;  %v3419_v56 = vld [vmem:[%s6570_s0 + $0x10] sm:$0xff] }
 0xb50   : > { %4524 = vmatmul.mubr.msk.f32.vlgmr.msra.gmra.mrb[38].mxu1 %vm2787_vm0, %v4500_v11 }
 0xb51   : > { %4530 = vmatprep.mubr.msk.f32.mxu1 %vm2318_vm1, %v2950_v57  ;;  %v4841_v57 = vpack.c.bf16 %v3521_v54, %v3520_v53 }
 0xc1d   : > { %v4516_v58 = vpop.f32.mrb[36].mxu1 }
 0xc1e   : > { %v2941_v59 = vpop.f32.mrb[37].mxu1  ;;  %v3112_v16 = vmul.f32 %v4516_v58, %v4516_v58  ;;  %v3420_v58 = vld [vmem:[%s6570_s0 + $0x18] sm:$0xff] }
 0xc1f   : > { %v3111_v26 = vmul.f32 %v2941_v59, %v2941_v59 }
 0xc23   : > { %v4525_v60 = vpop.f32.mrb[38].mxu1 }
 0xc24   : > { %v3021_v61 = vpop.f32.mrb[39].mxu1 }
 0xc25   : > { %v4822_v62 = vpack.c.bf16 %v4525_v60, %v3021_v61 }
 0xc27   : > { %4823 = vmatprep.subr.bf16.mxu1 %v4822_v62 }
 0xc28   : > { %4825 = vmatpush3.bf16.msra.mxu1 %v4822_v62 }
 0xc29   : > { %4826 = vmatprep.subr.bf16.mxu1 %v5408_v2 }
 0xc2b   : > { %4531 = vmatmul.mubr.msk.f32.vlgmr.msra.gmra.mrb[40].mxu1 %vm2318_vm1, %v2951_v63 }
 0xc2c   : > { %4539 = vmatprep.mubr.msk.f32.mxu1 %vm5409_vm2, %v5410_v4  ;;  %4828 = vmatpush3.bf16.msra.mxu1 %v4827_v3 }
 0xc2d   : > { %4537 = vmatprep.subr.mxu1 %v5410_v4 }
 0xc30   : > { %4538 = vmatpush3.msra.mxu1 %v3135_v5 }
 0xcfe   : > { %v4532_v6 = vpop.f32.mrb[40].mxu1 }
 0xcff   : > { %v3114_v17 = vmul.f32 %v4532_v6, %v4532_v6  ;;  %v3102_v18 = vpop.f32.mrb[41].mxu1 }
 0xd00   : > { %v3113_v27 = vmul.f32 %v3102_v18, %v3102_v18 }
 0xd01   : > { %v3116_v28 = vadd.f32 %v3114_v17, %v3112_v16 }
 0xd02   : > { %v3115_v29 = vadd.f32 %v3113_v27, %v3111_v26 }
 0xd03   : > { %v3118_v30 = vadd.f32 9e-12, %v3116_v28 }
 0xd04   : > { %v3117_v31 = vadd.f32 9e-12, %v3115_v29 }
 0xd06   : > { %v3119_v32 = vmul.f32 %v3118_v30, %v3117_v31  ;;  %v3129_v33 = vadd.f32 %v3118_v30, %v3117_v31 }
 0xd08   : > { %5024 = vrsqrt.f32 %v3119_v32  ;;  %v3130_v34 = vadd.f32 0.0234, %v3129_v33  ;;  %vm3122_vm3 = vcmp.eq.f32.partialorder %v3119_v32, inf  ;;  %v3125_v36 = vand.u32 2147483648, %v3119_v32 }
 0xd09   : > { %vm3124_vm4 = vcmp.eq.f32.partialorder %v3119_v32, 0.0 }
 0xd0a   : > { %5026 = vrcp.f32 %v3130_v34 }
 0xd12   : > { %v5025_v35 = vpop.eup %5024 }
 0xd13   : > { %v3121_v10 = vmul.f32 %v5025_v35, %v3119_v32 }
 0xd14   : > { %v5027_v12 = vpop.eup %5026 }
 0xd15   : > { %v3123_v37 = vsel %vm3122_vm3, %v3119_v32, %v3121_v10 }
 0xd16   : > { %v3126_v8 = vsel %vm3124_vm4, %v3125_v36, %v3123_v37 }
 0xd17   : > { %v3127_v19 = vmul.f32 2.0, %v3126_v8 }
 0xd19   : > { %v3128_v39 = vadd.f32 0.0234, %v3127_v19 }
 0xd1b   : > { %v3132_v20 = vmul.f32 %v5027_v12, %v3128_v39 }
 0xd1d   : > { %4540 = vmatmul.mubr.msk.f32.vlgmr.msra.gmra.mrb[42].mxu1 %vm2787_vm0, %v3132_v20 }
 0xd1e   : > { %4566 = vmatprep.mubr.msk.f32.mxu1 %vm1893_vm11, %v3417_v45 }
 0xdf0   : > { %v3205_v40 = vpop.f32.mrb[42].mxu1 }
 0xdf1   : > { %v4541_v24 = vpop.f32.mrb[43].mxu1  ;;  %4542 = vmatprep.subr.mxu0 %v3205_v40 }
 0xdf2   : > { %4543 = vmatpush3.msra.mxu0 %v3205_v40 }
 0xdf3   : > { %4545 = vmatmul.mubr.msk.f32.vlgmr.msra.gmra.mrb[36].mxu0 %vm3213_vm5, %v3210_v22  ;;  %4550 = vmatprep.subr.mxu0 %v3311_v23 }
 0xdf4   : > { %4547 = vmatprep.mubr.msk.f32.mxu0 %vm3213_vm5, %v3211_v25  ;;  %4551 = vmatpush3.msra.mxu0 %v3311_v23 }
 0xdf7   : > { %4548 = vmatmul.mubr.msk.f32.gmra.mrb[38].mxu0 %vm3213_vm5, %v3212_v41 }
 0xec6   : > { %v4546_v42 = vpop.f32.mrb[36].mxu0 }
 0xec7   : > { %v3292_v9 = vpop.f32.mrb[37].mxu0 }
 0xec8   : > { %4552 = vmatprep.mubr.msk.f32.mxu0 %vm3213_vm5, %v3292_v9 }
 0xec9   : > { %4553 = vmatmul.mubr.msk.f32.vlgmr.msra.gmra.mrb[30].mxu0 %vm3213_vm5, %v4546_v42 }
 0xeca   : > { %v4549_v43 = vpop.f32.mrb[38].mxu0 }
 0xecb   : > { %v3302_v44 = vpop.f32.mrb[39].mxu0 }
 0xecc   : > { %4555 = vmatprep.mubr.msk.f32.mxu0 %vm3213_vm5, %v3302_v44 }
 0xecd   : > { %4556 = vmatmul.mubr.msk.f32.gmra.mrb[32].mxu0 %vm3213_vm5, %v4549_v43 }
 0xf9c   : > { %v4554_v15 = vpop.f32.mrb[30].mxu0 }
 0xf9d   : > { %v3414_v7 = vsub.f32 1.0, %v4554_v15  ;;  %v3390_v46 = vpop.f32.mrb[31].mxu0 }
 0xf9e   : > { %v3413_v38 = vsub.f32 1.0, %v3390_v46 }
 0xfa0   : > { %v4829_v47 = vpack.c.bf16 %v3414_v7, %v3413_v38  ;;  %v4557_v13 = vpop.f32.mrb[32].mxu0 }
 0xfa1   : > { %v3416_v11 = vsub.f32 1.0, %v4557_v13  ;;  %v3400_v14 = vpop.f32.mrb[33].mxu0 }
 0xfa2   : > { %v3415_v50 = vsub.f32 1.0, %v3400_v14  ;;  %4830 = vmatprep.subr.bf16.mxu1 %v4829_v47 }
 0xfa3   : > { %4832 = vmatpush3.bf16.msra.mxu1 %v4829_v47 }
 0xfa4   : > { %v4833_v51 = vpack.c.bf16 %v3416_v11, %v3415_v50 }
 0xfa6   : > { %4834 = vmatprep.subr.bf16.mxu1 %v4833_v51 }
 0xfa7   : > { %4836 = vmatpush3.bf16.msra.mxu1 %v4833_v51 }
 0xfa8   : > { %4838 = vmatprep.subr.bf16.mxu1 %v4837_v52 }
 0xfaa   : > { %4567 = vmatmul.mubr.msk.f32.vlgmr.msra.gmra.mrb[44].mxu1 %vm1893_vm11, %v3418_v55 }
 0xfab   : > { %4569 = vmatprep.mubr.msk.f32.mxu1 %vm1893_vm11, %v3419_v56  ;;  %4840 = vmatpush3.bf16.msra.mxu1 %v4837_v52 }
 0xfac   : > { %4842 = vmatprep.subr.bf16.mxu1 %v4841_v57 }
 0xfae   : > { %4570 = vmatmul.mubr.msk.f32.gmra.mrb[46].mxu1 %vm1893_vm11, %v3420_v58 }
 0xfaf   : > { %4844 = vmatpush3.bf16.msra.mxu1 %v4841_v57 }
0x107d   : > { %v4568_v59 = vpop.f32.mrb[44].mxu1 }
0x107e   : > { %v3499_v60 = vpop.f32.mrb[45].mxu1 }
0x107f   : > { %4580 = vmatprep.mubr.msk.f32.mxu1 %vm1893_vm11, %v3499_v60 }
0x1080   : > { %4581 = vmatmul.mubr.msk.f32.vlgmr.msra.gmra.mrb[48].mxu1 %vm1893_vm11, %v4568_v59 }
0x1081   : > { %v4571_v61 = vpop.f32.mrb[46].mxu1 }
0x1082   : > { %v3509_v62 = vpop.f32.mrb[47].mxu1 }
0x1083   : > { %4583 = vmatprep.mubr.msk.f32.mxu1 %vm1893_vm11, %v3509_v62 }
0x1084   : > { %4584 = vmatmul.mubr.msk.f32.gmra.mrb[50].mxu1 %vm1893_vm11, %v4571_v61 }
0x1153   : > { %v4582_v63 = vpop.f32.mrb[48].mxu1 }
0x1154   : > { %v3620_v0 = vsel %vm1893_vm11, %v4582_v63, -inf  ;;  %v3600_v1 = vpop.f32.mrb[49].mxu1 }
0x1155   : > { %v3619_v2 = vsel %vm1893_vm11, %v3600_v1, -inf }
0x1156   : > { %v3623_v3 = vmax.f32 %v3619_v2, %v3620_v0 }
0x1157   : > { %v4585_v4 = vpop.f32.mrb[50].mxu1 }
0x1158   : > { %v3622_v5 = vsel %vm1893_vm11, %v4585_v4, -inf  ;;  %v3610_v6 = vpop.f32.mrb[51].mxu1 }
0x1159   : > { %v3621_v16 = vsel %vm1893_vm11, %v3610_v6, -inf }
0x115a   : > { %v3624_v17 = vmax.f32 %v3621_v16, %v3622_v5 }
0x115c   : > { %v3625_v18 = vmax.f32 %v3623_v3, %v3624_v17 }
0x115e   : > { %3626 = vmax.xlane.f32.xlu0 %v3625_v18 }
0x11eb   : > { %v3627_v26 = vpop.xlane.xlu0 %3626 }
0x11ec   : > { %v3628_v27 = vrot.slane %v3627_v26, 4 }
0x11ee   : > { %v3629_v28 = vmax.f32 %v3627_v26, %v3628_v27 }
0x11f0   : > { %v3630_v29 = vrot.slane %v3629_v28, 2 }
0x11f2   : > { %v3631_v30 = vmax.f32 %v3629_v28, %v3630_v29 }
0x11f4   : > { %v3632_v31 = vrot.slane %v3631_v30, 1 }
0x11f6   : > { %v3633_v32 = vmax.f32 %v3631_v30, %v3632_v31 }
0x11f8   : > { %4853 = vpush %v3633_v32 }
0x1229   : > { %s4854_s14 = spop %4853 }
0x122a   : > { %v3635_v33 = vstv %s4854_s14 }
0x122b   : > { %3636 = vst [vmem:[%s927_s3] sm:$0x1] %v3635_v33 }
0x122c   : > { %5321 = shalt.err (!%p5318_p7)
}
0x122d   : > { %s5322_s0 = scalar_lea.hbm %s6402_s4, 16  ;;  %s5326_s21 = scalar_lea.hbm %s6573_s1, 32 }
0x122e   : > { %p5323_p8 = scmp.ne.s32.totalorder %s6402_s4, %s5322_s0  ;;  %p5327_p1 = scmp.lt.u32.totalorder %s6402_s4, %s6573_s1 }
0x122f   : > { %p5328_p6 = scmp.lt.u32.totalorder %s5326_s21, %s5322_s0  ;;  %p5330_p5 = scmp.lt.u32.totalorder %s5322_s0, %s6402_s4 }
0x1230   : > { %p5324_p11 = pnand %p5323_p8, %p6574_p0 }
0x1231   : > { %p5329_p9 = por %p5328_p6, %p5327_p1 }
0x1232   : > { %p5325_p13 = pneg %p5324_p11 }
0x1233   : > { %p5331_p10 = por %p5330_p5, %p5329_p9 }
0x1235   : > { %p5332_p2 = pnand %p5331_p10, %p5325_p13 }
0x1237   : > { %5335 = shalt.err (!%p5332_p2)
}
0x1238   : > { %4895 = dma.vmem_to_hbm [thread:$0]  (%p6574_p0), %s6397_s28, 16, %s6402_s4, %s3638_s5  }
0x1239 PF: > { %s6575_s6 = sld [smem:[#allocation30_spill]]  ;;  %s6576_s9 = sld [smem:[#allocation27_spill]] }
0x123a   : > { %s6577_s8 = sld [smem:[#allocation34_spill]] }
0x123f   : > { %p4952_p3 = scmp.ge.s32.totalorder %s6575_s6, 2  ;;  %s3662_s7 = sand.u32 1, %s6576_s9  }
0x1240   : > { %p6578_p4 = scmp.ne.s32.totalorder %s6577_s8, 0  ;;  %s3663_s2 = scalar_lea.sflag [#allocation4], %s3662_s7 }
0x1242   : > { %p4929_p12 = pnand %p4952_p3, %p6578_p4 }
0x1244   : > { %5377 = dma.done.wait (!%p4929_p12), %s3663_s2, 16  }
0x1245   : > { %5379 = vsyncadd (!%p4929_p12), %s3663_s2, 4294967280  ;;  %s6579_s28 = sld [smem:[#allocation31_spill]]  ;;  %s6580_s27 = sld [smem:[#allocation28_spill]] }
0x1246   : > { %s6581_s3 = sld [smem:[#allocation29_spill]]  ;;  %s6582_s7 = sld [smem:[#allocation32_spill]] }
0x124b   : > { %p42_p7 = scmp.ge.s32.totalorder %s6579_s28, 4  }
0x124d   :  { %44 = sbr.rel (!%p42_p7) target bundleno = 28 (0x1c), region = 200 }
0x1254   :  { %3667 = vsyncpa [#allocation3], 1 }
0x1255   :  { %3669 = vsyncpa [#allocation3 + $0x1], 1 }
0x1256   :  { %3670 = vsyncpa [#allocation6], 1 }
0x1257   :  { %3671 = vsyncpa [#allocation9], 1 }
0x1258   :  { %3672 = vsyncpa [#allocation12], 1 }
0x1259   :  { %3673 = vsyncpa [#allocation15], 1 }
0x125a   :  { %3674 = vsyncpa [#allocation18], 1 }
0x125b   :  { %3675 = vsyncpa [#allocation4], 1 }
0x125c   :  { %3677 = vsyncpa [#allocation4 + $0x1], 1 }

</bundles_post_ra>
